<compile_context>
chip_gen: v6e
topology: v6e:2x2x1
jax: 0.10.0
libtpu: 0.0.40
codegen_flags: <defaults>
</compile_context>

<pallas_src>
import functools
import math

import jax
import jax.numpy as jnp
from jax.experimental import pallas as pl
from jax.experimental.pallas import tpu as pltpu

BF16 = jnp.bfloat16
F32 = jnp.float32
NEG_INF = -1e9
VMEM_LIMIT = 48 * 1024 * 1024   # explicit budget; safe on v5e/v6e (128 MiB) and v7x (64 MiB)


# --------------------------------------------------------------------------------------
# Kernel 1: encoder-decoder transformer body. Grid over batch ("parallel" -> megacore).
# Per grid step everything is 2-D: activations (S,H)/(T,H), weights (H,H)/(H,F)/(F,H).
# --------------------------------------------------------------------------------------
def transformer_body_kernel(src_tok_ref, enc_x_ref, dec_x_ref, attn_w_ref,
                            ffn_w1_ref, ffn_b1_ref, ffn_w2_ref, ffn_b2_ref,
                            ln_g_ref, ln_b_ref, y_ref, *, padding_idx):
    H = enc_x_ref.shape[2]
    S = enc_x_ref.shape[1]
    T = dec_x_ref.shape[1]
    inv_sqrt_h = 1.0 / math.sqrt(H)

    def layer_norm(x, idx):
        # single-pass: E[x], E[x^2]  (f32 statistics)
        g = ln_g_ref[idx:idx + 1, :]          # (1, H)
        b = ln_b_ref[idx:idx + 1, :]          # (1, H)
        mu = jnp.mean(x, axis=-1, keepdims=True)
        ms = jnp.mean(x * x, axis=-1, keepdims=True)
        var = ms - mu * mu
        return (x - mu) * jax.lax.rsqrt(var + 1e-5) * g + b

    def attention(q_in, kv_in, layer, bias):
        # q_in: (Tq, H) f32, kv_in: (Tk, H) f32; weights sliced from ref at use-site.
        wq = attn_w_ref[layer, 0]             # (H, H) bf16
        wk = attn_w_ref[layer, 1]
        wv = attn_w_ref[layer, 2]
        wo = attn_w_ref[layer, 3]
        q = jnp.dot(q_in.astype(BF16), wq, preferred_element_type=F32) * inv_sqrt_h
        k = jnp.dot(kv_in.astype(BF16), wk, preferred_element_type=F32)
        v = jnp.dot(kv_in.astype(BF16), wv, preferred_element_type=F32)
        s = jnp.dot(q.astype(BF16), k.astype(BF16).T,
                    preferred_element_type=F32) + bias          # (Tq, Tk) f32
        m = jnp.max(s, axis=-1, keepdims=True)
        e = jnp.exp(s - m)
        denom = jnp.sum(e, axis=-1, keepdims=True)
        p = e * pl.reciprocal(denom, approx=True)               # EUP reciprocal
        o = jnp.dot(p.astype(BF16), v.astype(BF16), preferred_element_type=F32)
        return jnp.dot(o.astype(BF16), wo, preferred_element_type=F32)

    def ffn(x, layer):
        w1 = ffn_w1_ref[layer]                # (H, F) bf16
        w2 = ffn_w2_ref[layer]                # (F, H) bf16
        b1 = ffn_b1_ref[layer:layer + 1, :]   # (1, F) f32
        b2 = ffn_b2_ref[layer:layer + 1, :]   # (1, H) f32
        h = jnp.dot(x.astype(BF16), w1, preferred_element_type=F32) + b1
        h = jnp.maximum(h, 0.0)
        return jnp.dot(h.astype(BF16), w2, preferred_element_type=F32) + b2

    # masks built in-kernel (no HBM traffic for them)
    src_tok = src_tok_ref[0]                                     # (1, S) int32
    pad_bias = jnp.where(src_tok != padding_idx, 0.0, NEG_INF).astype(F32)   # (1, S)
    row = jax.lax.broadcasted_iota(jnp.int32, (T, T), 0)
    col = jax.lax.broadcasted_iota(jnp.int32, (T, T), 1)
    causal_bias = jnp.where(row >= col, 0.0, NEG_INF).astype(F32)            # (T, T)

    # ----- encoder (single post-LN layer) -----
    x = enc_x_ref[0].astype(F32)                                 # (S, H)
    x = layer_norm(x + attention(x, x, 0, pad_bias), 0)
    x = layer_norm(x + ffn(x, 0), 1)
    enc_out = x

    # ----- decoder (masked self-attn, cross-attn, FFN) -----
    y = dec_x_ref[0].astype(F32)                                 # (T, H)
    y = layer_norm(y + attention(y, y, 1, causal_bias), 2)
    y = layer_norm(y + attention(y, enc_out, 2, pad_bias), 3)
    y = layer_norm(y + ffn(y, 1), 4)

    y_ref[0] = y.astype(BF16)


# --------------------------------------------------------------------------------------
# Kernel 2: vocabulary projection, tiled over V ("parallel" grid, lane-dense TN=128).
# --------------------------------------------------------------------------------------
def vocab_proj_kernel(y_ref, out_w_ref, out_b_ref, logits_ref):
    B, T, H = y_ref.shape
    TN = out_w_ref.shape[1]
    y2 = y_ref[...].reshape(B * T, H)                            # bf16
    logits = jnp.dot(y2, out_w_ref[...], preferred_element_type=F32)
    logits = logits + out_b_ref[...]                             # (1, TN) broadcast
    logits_ref[...] = logits.reshape(B, T, TN)


# --------------------------------------------------------------------------------------
# Parameters
# --------------------------------------------------------------------------------------
def make_params(key, v_enc, v_dec, hidden, ffn_dim, max_len):
    ks = jax.random.split(key, 7)
    s = 0.02
    return {
        'enc_emb': (jax.random.normal(ks[0], (v_enc, hidden), F32) * s).astype(BF16),
        'dec_emb': (jax.random.normal(ks[1], (v_dec, hidden), F32) * s).astype(BF16),
        'pos':     (jax.random.normal(ks[2], (max_len, hidden), F32) * s).astype(BF16),
        'attn_w':  (jax.random.normal(ks[3], (3, 4, hidden, hidden), F32) * s).astype(BF16),
        'ffn_w1':  (jax.random.normal(ks[4], (2, hidden, ffn_dim), F32) * s).astype(BF16),
        'ffn_b1':  jnp.zeros((2, ffn_dim), F32),
        'ffn_w2':  (jax.random.normal(ks[5], (2, ffn_dim, hidden), F32) * s).astype(BF16),
        'ffn_b2':  jnp.zeros((2, hidden), F32),
        'ln_g':    jnp.ones((5, hidden), F32),
        'ln_b':    jnp.zeros((5, hidden), F32),
        'out_w':   (jax.random.normal(ks[6], (hidden, v_dec), F32) * s).astype(BF16),
        'out_b':   jnp.zeros((1, v_dec), F32),
    }


# --------------------------------------------------------------------------------------
# Forward wrapper: mirrors TranslationModel.forward(src_tokens, src_lengths, prev_output_tokens)
# --------------------------------------------------------------------------------------
def translation_model_forward(src_tokens, src_lengths, prev_output_tokens,
                              params, padding_idx=0, vocab_tile=128):
    del src_lengths  # present in the reference signature, unused by the net
    B, S = src_tokens.shape
    T = prev_output_tokens.shape[1]
    H = params['enc_emb'].shape[1]
    F = params['ffn_w1'].shape[2]
    V = params['out_w'].shape[1]

    # ntokens = torch.sign(dec_input.float()).sum()  -- cheap scalar, plain XLA
    ntokens = jnp.sum(jnp.sign(prev_output_tokens.astype(F32)))

    # Embedding lookup as a real gather (no one-hot matmul) + positional encoding.
    enc_x = jnp.take(params['enc_emb'], src_tokens, axis=0) + params['pos'][:S][None]
    dec_x = jnp.take(params['dec_emb'], prev_output_tokens, axis=0) + params['pos'][:T][None]
    enc_x = enc_x.astype(BF16)                                   # (B, S, H)
    dec_x = dec_x.astype(BF16)                                   # (B, T, H)
    src_tok3 = src_tokens.astype(jnp.int32).reshape(B, 1, S)     # for in-kernel pad bias

    # ----- kernel 1: transformer body, grid over batch -----
    body = functools.partial(transformer_body_kernel, padding_idx=padding_idx)
    y = pl.pallas_call(
        body,
        grid=(B,),
        in_specs=[
            pl.BlockSpec((1, 1, S), lambda b: (b, 0, 0)),               # src tokens
            pl.BlockSpec((1, S, H), lambda b: (b, 0, 0)),               # enc_x
            pl.BlockSpec((1, T, H), lambda b: (b, 0, 0)),               # dec_x
            pl.BlockSpec((3, 4, H, H), lambda b: (0, 0, 0, 0)),         # attn_w
            pl.BlockSpec((2, H, F), lambda b: (0, 0, 0)),               # ffn_w1
            pl.BlockSpec((2, F), lambda b: (0, 0)),                     # ffn_b1
            pl.BlockSpec((2, F, H), lambda b: (0, 0, 0)),               # ffn_w2
            pl.BlockSpec((2, H), lambda b: (0, 0)),                     # ffn_b2
            pl.BlockSpec((5, H), lambda b: (0, 0)),                     # ln_g
            pl.BlockSpec((5, H), lambda b: (0, 0)),                     # ln_b
        ],
        out_specs=pl.BlockSpec((1, T, H), lambda b: (b, 0, 0)),
        out_shape=jax.ShapeDtypeStruct((B, T, H), BF16),
        compiler_params=pltpu.CompilerParams(
            dimension_semantics=("parallel",),
            vmem_limit_bytes=VMEM_LIMIT),
    )(src_tok3, enc_x, dec_x, params['attn_w'], params['ffn_w1'],
      params['ffn_b1'], params['ffn_w2'], params['ffn_b2'],
      params['ln_g'], params['ln_b'])

    # ----- kernel 2: vocabulary projection, tiled over V -----
    TN = min(vocab_tile, V)
    assert V % TN == 0 and TN % 128 == 0
    logits = pl.pallas_call(
        vocab_proj_kernel,
        grid=(V // TN,),
        in_specs=[
            pl.BlockSpec((B, T, H), lambda j: (0, 0, 0)),               # y (resident)
            pl.BlockSpec((H, TN), lambda j: (0, j)),                    # out_w tile
            pl.BlockSpec((1, TN), lambda j: (0, j)),                    # out_b tile
        ],
        out_specs=pl.BlockSpec((B, T, TN), lambda j: (0, 0, j)),
        out_shape=jax.ShapeDtypeStruct((B, T, V), F32),
        compiler_params=pltpu.CompilerParams(
            dimension_semantics=("parallel",),
            vmem_limit_bytes=VMEM_LIMIT),
    )(y, params['out_w'], params['out_b'])

    # net_output: decoder logits + extras (exact return pytree of the external
    # TransformerModel is unavailable; ntokens matches forward()'s mask.sum()).
    return logits, {'ntokens': ntokens}


if __name__ == "__main__":
    # MXU-aligned small demo shapes: batch=2, seq=16, hidden=128, ffn=256, vocab=256
    B, S, H, F, V = 2, 16, 128, 256, 256
    key = jax.random.PRNGKey(0)
    k_src, k_dec, k_par = jax.random.split(key, 3)

    src_tokens = jax.random.randint(k_src, (B, S), 1, V, dtype=jnp.int32)
    src_tokens = src_tokens.at[:, -2:].set(0)                    # PAD = 0 at the tail
    prev_output_tokens = jax.random.randint(k_dec, (B, S), 1, V, dtype=jnp.int32)
    prev_output_tokens = prev_output_tokens.at[:, -1].set(0)
    src_lengths = jnp.full((B,), S - 2, dtype=jnp.int32)

    params = make_params(k_par, V, V, H, F, S)

    logits, extra = translation_model_forward(src_tokens, src_lengths,
                                              prev_output_tokens, params)
    logits = jax.block_until_ready(logits)
    ntokens = jax.block_until_ready(extra['ntokens'])

    assert logits.shape == (B, S, V)
    assert logits.dtype == jnp.float32
    assert bool(jnp.all(jnp.isfinite(logits)))
    assert bool(ntokens == float(jnp.sum(prev_output_tokens != 0)))
    print("KERNEL_OK")
</pallas_src>

<mosaic_0001>
module attributes {stable_mosaic.version = 11 : i64} {
  func.func @transformer_body_kernel(%arg0: i32, %arg1: memref<1x1x16xi32, #tpu.memory_space<vmem>>, %arg2: memref<1x16x128xbf16, #tpu.memory_space<vmem>>, %arg3: memref<1x16x128xbf16, #tpu.memory_space<vmem>>, %arg4: memref<3x4x128x128xbf16, #tpu.memory_space<vmem>>, %arg5: memref<2x128x256xbf16, #tpu.memory_space<vmem>>, %arg6: memref<2x256xf32, #tpu.memory_space<vmem>>, %arg7: memref<2x256x128xbf16, #tpu.memory_space<vmem>>, %arg8: memref<2x128xf32, #tpu.memory_space<vmem>>, %arg9: memref<5x128xf32, #tpu.memory_space<vmem>>, %arg10: memref<5x128xf32, #tpu.memory_space<vmem>>, %arg11: memref<1x16x128xbf16, #tpu.memory_space<vmem>>) attributes {dimension_semantics = [#tpu.dimension_semantics<parallel>], iteration_bounds = array<i64: 2>, scalar_prefetch = 0 : i64, scratch_operands = 0 : i64, tpu.core_type = #tpu.core_type<tc>, window_params = [{transform_indices = @transform_0, window_bounds = array<i64: 1, 1, 16>}, {transform_indices = @transform_1, window_bounds = array<i64: 1, 16, 128>}, {transform_indices = @transform_2, window_bounds = array<i64: 1, 16, 128>}, {pipeline_mode = #tpu.pipeline_mode<synchronous>, transform_indices = @transform_3, window_bounds = array<i64: 3, 4, 128, 128>}, {pipeline_mode = #tpu.pipeline_mode<synchronous>, transform_indices = @transform_4, window_bounds = array<i64: 2, 128, 256>}, {pipeline_mode = #tpu.pipeline_mode<synchronous>, transform_indices = @transform_5, window_bounds = array<i64: 2, 256>}, {pipeline_mode = #tpu.pipeline_mode<synchronous>, transform_indices = @transform_6, window_bounds = array<i64: 2, 256, 128>}, {pipeline_mode = #tpu.pipeline_mode<synchronous>, transform_indices = @transform_7, window_bounds = array<i64: 2, 128>}, {pipeline_mode = #tpu.pipeline_mode<synchronous>, transform_indices = @transform_8, window_bounds = array<i64: 5, 128>}, {pipeline_mode = #tpu.pipeline_mode<synchronous>, transform_indices = @transform_9, window_bounds = array<i64: 5, 128>}, {transform_indices = @transform_10, window_bounds = array<i64: 1, 16, 128>}]} {
    %c0 = arith.constant 0 : index
    %c0_0 = arith.constant 0 : index
    %c0_1 = arith.constant 0 : index
    %0 = vector.load %arg1[%c0, %c0_0, %c0_1] : memref<1x1x16xi32, #tpu.memory_space<vmem>>, vector<1x1x16xi32>
    %1 = vector.shape_cast %0 : vector<1x1x16xi32> to vector<1x16xi32>
    %c0_i32 = arith.constant 0 : i32
    %2 = vector.broadcast %c0_i32 : i32 to vector<1x16xi32>
    %3 = arith.cmpi ne, %1, %2 : vector<1x16xi32>
    %cst = arith.constant 0.000000e+00 : f32
    %cst_2 = arith.constant -1.000000e+09 : f32
    %4 = vector.broadcast %cst : f32 to vector<1x16xf32>
    %5 = vector.broadcast %cst_2 : f32 to vector<1x16xf32>
    %6 = arith.select %3, %4, %5 : vector<1x16xi1>, vector<1x16xf32>
    %7 = tpu.iota {dimensions = array<i32: 0>} : vector<16x16xi32>
    %8 = tpu.iota {dimensions = array<i32: 1>} : vector<16x16xi32>
    %9 = arith.cmpi sge, %7, %8 : vector<16x16xi32>
    %cst_3 = arith.constant 0.000000e+00 : f32
    %cst_4 = arith.constant -1.000000e+09 : f32
    %10 = vector.broadcast %cst_3 : f32 to vector<16x16xf32>
    %11 = vector.broadcast %cst_4 : f32 to vector<16x16xf32>
    %12 = arith.select %9, %10, %11 : vector<16x16xi1>, vector<16x16xf32>
    %c0_5 = arith.constant 0 : index
    %c0_6 = arith.constant 0 : index
    %c0_7 = arith.constant 0 : index
    %13 = vector.load %arg2[%c0_5, %c0_6, %c0_7] : memref<1x16x128xbf16, #tpu.memory_space<vmem>>, vector<1x16x128xbf16>
    %14 = vector.shape_cast %13 : vector<1x16x128xbf16> to vector<16x128xbf16>
    %15 = arith.extf %14 : vector<16x128xbf16> to vector<16x128xf32>
    %c0_8 = arith.constant 0 : index
    %c0_9 = arith.constant 0 : index
    %c0_10 = arith.constant 0 : index
    %c0_11 = arith.constant 0 : index
    %16 = vector.load %arg4[%c0_8, %c0_9, %c0_10, %c0_11] : memref<3x4x128x128xbf16, #tpu.memory_space<vmem>>, vector<1x1x128x128xbf16>
    %17 = vector.shape_cast %16 : vector<1x1x128x128xbf16> to vector<128x128xbf16>
    %c0_12 = arith.constant 0 : index
    %c1 = arith.constant 1 : index
    %c0_13 = arith.constant 0 : index
    %c0_14 = arith.constant 0 : index
    %18 = vector.load %arg4[%c0_12, %c1, %c0_13, %c0_14] : memref<3x4x128x128xbf16, #tpu.memory_space<vmem>>, vector<1x1x128x128xbf16>
    %19 = vector.shape_cast %18 : vector<1x1x128x128xbf16> to vector<128x128xbf16>
    %c0_15 = arith.constant 0 : index
    %c2 = arith.constant 2 : index
    %c0_16 = arith.constant 0 : index
    %c0_17 = arith.constant 0 : index
    %20 = vector.load %arg4[%c0_15, %c2, %c0_16, %c0_17] : memref<3x4x128x128xbf16, #tpu.memory_space<vmem>>, vector<1x1x128x128xbf16>
    %21 = vector.shape_cast %20 : vector<1x1x128x128xbf16> to vector<128x128xbf16>
    %c0_18 = arith.constant 0 : index
    %c3 = arith.constant 3 : index
    %c0_19 = arith.constant 0 : index
    %c0_20 = arith.constant 0 : index
    %22 = vector.load %arg4[%c0_18, %c3, %c0_19, %c0_20] : memref<3x4x128x128xbf16, #tpu.memory_space<vmem>>, vector<1x1x128x128xbf16>
    %23 = vector.shape_cast %22 : vector<1x1x128x128xbf16> to vector<128x128xbf16>
    %24 = arith.truncf %15 : vector<16x128xf32> to vector<16x128xbf16>
    %cst_21 = arith.constant dense<0.000000e+00> : vector<16x128xf32>
    %25 = tpu.matmul %24, %17, %cst_21 {dimension_numbers = #tpu.dot_dimension_numbers<[1], [0], [0], [1], [0, 0, 1, 1], [], []>} : vector<16x128xbf16>, vector<128x128xbf16>, vector<16x128xf32> -> vector<16x128xf32>
    %cst_22 = arith.constant 0.0883883461 : f32
    %26 = vector.broadcast %cst_22 : f32 to vector<16x128xf32>
    %27 = arith.mulf %25, %26 : vector<16x128xf32>
    %28 = arith.truncf %15 : vector<16x128xf32> to vector<16x128xbf16>
    %cst_23 = arith.constant dense<0.000000e+00> : vector<16x128xf32>
    %29 = tpu.matmul %28, %19, %cst_23 {dimension_numbers = #tpu.dot_dimension_numbers<[1], [0], [0], [1], [0, 0, 1, 1], [], []>} : vector<16x128xbf16>, vector<128x128xbf16>, vector<16x128xf32> -> vector<16x128xf32>
    %30 = arith.truncf %15 : vector<16x128xf32> to vector<16x128xbf16>
    %cst_24 = arith.constant dense<0.000000e+00> : vector<16x128xf32>
    %31 = tpu.matmul %30, %21, %cst_24 {dimension_numbers = #tpu.dot_dimension_numbers<[1], [0], [0], [1], [0, 0, 1, 1], [], []>} : vector<16x128xbf16>, vector<128x128xbf16>, vector<16x128xf32> -> vector<16x128xf32>
    %32 = arith.truncf %27 : vector<16x128xf32> to vector<16x128xbf16>
    %33 = arith.truncf %29 : vector<16x128xf32> to vector<16x128xbf16>
    %34 = tpu.transpose %33, [1, 0] : vector<16x128xbf16> -> vector<128x16xbf16>
    %cst_25 = arith.constant dense<0.000000e+00> : vector<16x16xf32>
    %35 = tpu.matmul %32, %34, %cst_25 {dimension_numbers = #tpu.dot_dimension_numbers<[1], [0], [0], [1], [0, 0, 1, 1], [], []>} : vector<16x128xbf16>, vector<128x16xbf16>, vector<16x16xf32> -> vector<16x16xf32>
    %36 = vector.broadcast %6 : vector<1x16xf32> to vector<16x16xf32>
    %37 = arith.addf %35, %36 : vector<16x16xf32>
    %cst_26 = arith.constant dense<0xFF800000> : vector<16xf32>
    %38 = vector.multi_reduction <maximumf>, %37, %cst_26 [1] : vector<16x16xf32> to vector<16xf32>
    %39 = vector.shape_cast %38 : vector<16xf32> to vector<16x1xf32>
    %40 = vector.broadcast %39 : vector<16x1xf32> to vector<16x16xf32>
    %41 = arith.subf %37, %40 : vector<16x16xf32>
    %42 = math.exp %41 : vector<16x16xf32>
    %cst_27 = arith.constant dense<0.000000e+00> : vector<16xf32>
    %43 = vector.multi_reduction <add>, %42, %cst_27 [1] : vector<16x16xf32> to vector<16xf32>
    %44 = vector.shape_cast %43 : vector<16xf32> to vector<16x1xf32>
    %45 = tpu.reciprocal %44 {approx = true} : vector<16x1xf32> -> vector<16x1xf32>
    %46 = vector.broadcast %45 : vector<16x1xf32> to vector<16x16xf32>
    %47 = arith.mulf %42, %46 : vector<16x16xf32>
    %48 = arith.truncf %47 : vector<16x16xf32> to vector<16x16xbf16>
    %49 = arith.truncf %31 : vector<16x128xf32> to vector<16x128xbf16>
    %cst_28 = arith.constant dense<0.000000e+00> : vector<16x128xf32>
    %50 = tpu.matmul %48, %49, %cst_28 {dimension_numbers = #tpu.dot_dimension_numbers<[1], [0], [0], [1], [0, 0, 1, 1], [], []>} : vector<16x16xbf16>, vector<16x128xbf16>, vector<16x128xf32> -> vector<16x128xf32>
    %51 = arith.truncf %50 : vector<16x128xf32> to vector<16x128xbf16>
    %cst_29 = arith.constant dense<0.000000e+00> : vector<16x128xf32>
    %52 = tpu.matmul %51, %23, %cst_29 {dimension_numbers = #tpu.dot_dimension_numbers<[1], [0], [0], [1], [0, 0, 1, 1], [], []>} : vector<16x128xbf16>, vector<128x128xbf16>, vector<16x128xf32> -> vector<16x128xf32>
    %53 = arith.addf %15, %52 : vector<16x128xf32>
    %c0_30 = arith.constant 0 : index
    %c0_31 = arith.constant 0 : index
    %54 = vector.load %arg9[%c0_30, %c0_31] : memref<5x128xf32, #tpu.memory_space<vmem>>, vector<1x128xf32>
    %c0_32 = arith.constant 0 : index
    %c0_33 = arith.constant 0 : index
    %55 = vector.load %arg10[%c0_32, %c0_33] : memref<5x128xf32, #tpu.memory_space<vmem>>, vector<1x128xf32>
    %cst_34 = arith.constant dense<0.000000e+00> : vector<16xf32>
    %56 = vector.multi_reduction <add>, %53, %cst_34 [1] : vector<16x128xf32> to vector<16xf32>
    %57 = vector.shape_cast %56 : vector<16xf32> to vector<16x1xf32>
    %cst_35 = arith.constant 1.280000e+02 : f32
    %58 = vector.broadcast %cst_35 : f32 to vector<16x1xf32>
    %59 = arith.divf %57, %58 : vector<16x1xf32>
    %60 = arith.mulf %53, %53 : vector<16x128xf32>
    %cst_36 = arith.constant dense<0.000000e+00> : vector<16xf32>
    %61 = vector.multi_reduction <add>, %60, %cst_36 [1] : vector<16x128xf32> to vector<16xf32>
    %62 = vector.shape_cast %61 : vector<16xf32> to vector<16x1xf32>
    %cst_37 = arith.constant 1.280000e+02 : f32
    %63 = vector.broadcast %cst_37 : f32 to vector<16x1xf32>
    %64 = arith.divf %62, %63 : vector<16x1xf32>
    %65 = arith.mulf %59, %59 : vector<16x1xf32>
    %66 = arith.subf %64, %65 : vector<16x1xf32>
    %67 = vector.broadcast %59 : vector<16x1xf32> to vector<16x128xf32>
    %68 = arith.subf %53, %67 : vector<16x128xf32>
    %cst_38 = arith.constant 9.99999974E-6 : f32
    %69 = vector.broadcast %cst_38 : f32 to vector<16x1xf32>
    %70 = arith.addf %66, %69 : vector<16x1xf32>
    %71 = math.rsqrt %70 : vector<16x1xf32>
    %72 = vector.broadcast %71 : vector<16x1xf32> to vector<16x128xf32>
    %73 = arith.mulf %68, %72 : vector<16x128xf32>
    %74 = vector.broadcast %54 : vector<1x128xf32> to vector<16x128xf32>
    %75 = arith.mulf %73, %74 : vector<16x128xf32>
    %76 = vector.broadcast %55 : vector<1x128xf32> to vector<16x128xf32>
    %77 = arith.addf %75, %76 : vector<16x128xf32>
    %c0_39 = arith.constant 0 : index
    %c0_40 = arith.constant 0 : index
    %c0_41 = arith.constant 0 : index
    %78 = vector.load %arg5[%c0_39, %c0_40, %c0_41] : memref<2x128x256xbf16, #tpu.memory_space<vmem>>, vector<1x128x256xbf16>
    %79 = vector.shape_cast %78 : vector<1x128x256xbf16> to vector<128x256xbf16>
    %c0_42 = arith.constant 0 : index
    %c0_43 = arith.constant 0 : index
    %c0_44 = arith.constant 0 : index
    %80 = vector.load %arg7[%c0_42, %c0_43, %c0_44] : memref<2x256x128xbf16, #tpu.memory_space<vmem>>, vector<1x256x128xbf16>
    %81 = vector.shape_cast %80 : vector<1x256x128xbf16> to vector<256x128xbf16>
    %c0_45 = arith.constant 0 : index
    %c0_46 = arith.constant 0 : index
    %82 = vector.load %arg6[%c0_45, %c0_46] : memref<2x256xf32, #tpu.memory_space<vmem>>, vector<1x256xf32>
    %c0_47 = arith.constant 0 : index
    %c0_48 = arith.constant 0 : index
    %83 = vector.load %arg8[%c0_47, %c0_48] : memref<2x128xf32, #tpu.memory_space<vmem>>, vector<1x128xf32>
    %84 = arith.truncf %77 : vector<16x128xf32> to vector<16x128xbf16>
    %cst_49 = arith.constant dense<0.000000e+00> : vector<16x256xf32>
    %85 = tpu.matmul %84, %79, %cst_49 {dimension_numbers = #tpu.dot_dimension_numbers<[1], [0], [0], [1], [0, 0, 1, 1], [], []>} : vector<16x128xbf16>, vector<128x256xbf16>, vector<16x256xf32> -> vector<16x256xf32>
    %86 = vector.broadcast %82 : vector<1x256xf32> to vector<16x256xf32>
    %87 = arith.addf %85, %86 : vector<16x256xf32>
    %cst_50 = arith.constant 0.000000e+00 : f32
    %88 = vector.broadcast %cst_50 : f32 to vector<16x256xf32>
    %89 = arith.maximumf %87, %88 : vector<16x256xf32>
    %90 = arith.truncf %89 : vector<16x256xf32> to vector<16x256xbf16>
    %cst_51 = arith.constant dense<0.000000e+00> : vector<16x128xf32>
    %91 = tpu.matmul %90, %81, %cst_51 {dimension_numbers = #tpu.dot_dimension_numbers<[1], [0], [0], [1], [0, 0, 1, 1], [], []>} : vector<16x256xbf16>, vector<256x128xbf16>, vector<16x128xf32> -> vector<16x128xf32>
    %92 = vector.broadcast %83 : vector<1x128xf32> to vector<16x128xf32>
    %93 = arith.addf %91, %92 : vector<16x128xf32>
    %94 = arith.addf %77, %93 : vector<16x128xf32>
    %c1_52 = arith.constant 1 : index
    %c0_53 = arith.constant 0 : index
    %95 = vector.load %arg9[%c1_52, %c0_53] : memref<5x128xf32, #tpu.memory_space<vmem>>, vector<1x128xf32>
    %c1_54 = arith.constant 1 : index
    %c0_55 = arith.constant 0 : index
    %96 = vector.load %arg10[%c1_54, %c0_55] : memref<5x128xf32, #tpu.memory_space<vmem>>, vector<1x128xf32>
    %cst_56 = arith.constant dense<0.000000e+00> : vector<16xf32>
    %97 = vector.multi_reduction <add>, %94, %cst_56 [1] : vector<16x128xf32> to vector<16xf32>
    %98 = vector.shape_cast %97 : vector<16xf32> to vector<16x1xf32>
    %cst_57 = arith.constant 1.280000e+02 : f32
    %99 = vector.broadcast %cst_57 : f32 to vector<16x1xf32>
    %100 = arith.divf %98, %99 : vector<16x1xf32>
    %101 = arith.mulf %94, %94 : vector<16x128xf32>
    %cst_58 = arith.constant dense<0.000000e+00> : vector<16xf32>
    %102 = vector.multi_reduction <add>, %101, %cst_58 [1] : vector<16x128xf32> to vector<16xf32>
    %103 = vector.shape_cast %102 : vector<16xf32> to vector<16x1xf32>
    %cst_59 = arith.constant 1.280000e+02 : f32
    %104 = vector.broadcast %cst_59 : f32 to vector<16x1xf32>
    %105 = arith.divf %103, %104 : vector<16x1xf32>
    %106 = arith.mulf %100, %100 : vector<16x1xf32>
    %107 = arith.subf %105, %106 : vector<16x1xf32>
    %108 = vector.broadcast %100 : vector<16x1xf32> to vector<16x128xf32>
    %109 = arith.subf %94, %108 : vector<16x128xf32>
    %cst_60 = arith.constant 9.99999974E-6 : f32
    %110 = vector.broadcast %cst_60 : f32 to vector<16x1xf32>
    %111 = arith.addf %107, %110 : vector<16x1xf32>
    %112 = math.rsqrt %111 : vector<16x1xf32>
    %113 = vector.broadcast %112 : vector<16x1xf32> to vector<16x128xf32>
    %114 = arith.mulf %109, %113 : vector<16x128xf32>
    %115 = vector.broadcast %95 : vector<1x128xf32> to vector<16x128xf32>
    %116 = arith.mulf %114, %115 : vector<16x128xf32>
    %117 = vector.broadcast %96 : vector<1x128xf32> to vector<16x128xf32>
    %118 = arith.addf %116, %117 : vector<16x128xf32>
    %c0_61 = arith.constant 0 : index
    %c0_62 = arith.constant 0 : index
    %c0_63 = arith.constant 0 : index
    %119 = vector.load %arg3[%c0_61, %c0_62, %c0_63] : memref<1x16x128xbf16, #tpu.memory_space<vmem>>, vector<1x16x128xbf16>
    %120 = vector.shape_cast %119 : vector<1x16x128xbf16> to vector<16x128xbf16>
    %121 = arith.extf %120 : vector<16x128xbf16> to vector<16x128xf32>
    %c1_64 = arith.constant 1 : index
    %c0_65 = arith.constant 0 : index
    %c0_66 = arith.constant 0 : index
    %c0_67 = arith.constant 0 : index
    %122 = vector.load %arg4[%c1_64, %c0_65, %c0_66, %c0_67] : memref<3x4x128x128xbf16, #tpu.memory_space<vmem>>, vector<1x1x128x128xbf16>
    %123 = vector.shape_cast %122 : vector<1x1x128x128xbf16> to vector<128x128xbf16>
    %c1_68 = arith.constant 1 : index
    %c1_69 = arith.constant 1 : index
    %c0_70 = arith.constant 0 : index
    %c0_71 = arith.constant 0 : index
    %124 = vector.load %arg4[%c1_68, %c1_69, %c0_70, %c0_71] : memref<3x4x128x128xbf16, #tpu.memory_space<vmem>>, vector<1x1x128x128xbf16>
    %125 = vector.shape_cast %124 : vector<1x1x128x128xbf16> to vector<128x128xbf16>
    %c1_72 = arith.constant 1 : index
    %c2_73 = arith.constant 2 : index
    %c0_74 = arith.constant 0 : index
    %c0_75 = arith.constant 0 : index
    %126 = vector.load %arg4[%c1_72, %c2_73, %c0_74, %c0_75] : memref<3x4x128x128xbf16, #tpu.memory_space<vmem>>, vector<1x1x128x128xbf16>
    %127 = vector.shape_cast %126 : vector<1x1x128x128xbf16> to vector<128x128xbf16>
    %c1_76 = arith.constant 1 : index
    %c3_77 = arith.constant 3 : index
    %c0_78 = arith.constant 0 : index
    %c0_79 = arith.constant 0 : index
    %128 = vector.load %arg4[%c1_76, %c3_77, %c0_78, %c0_79] : memref<3x4x128x128xbf16, #tpu.memory_space<vmem>>, vector<1x1x128x128xbf16>
    %129 = vector.shape_cast %128 : vector<1x1x128x128xbf16> to vector<128x128xbf16>
    %130 = arith.truncf %121 : vector<16x128xf32> to vector<16x128xbf16>
    %cst_80 = arith.constant dense<0.000000e+00> : vector<16x128xf32>
    %131 = tpu.matmul %130, %123, %cst_80 {dimension_numbers = #tpu.dot_dimension_numbers<[1], [0], [0], [1], [0, 0, 1, 1], [], []>} : vector<16x128xbf16>, vector<128x128xbf16>, vector<16x128xf32> -> vector<16x128xf32>
    %cst_81 = arith.constant 0.0883883461 : f32
    %132 = vector.broadcast %cst_81 : f32 to vector<16x128xf32>
    %133 = arith.mulf %131, %132 : vector<16x128xf32>
    %134 = arith.truncf %121 : vector<16x128xf32> to vector<16x128xbf16>
    %cst_82 = arith.constant dense<0.000000e+00> : vector<16x128xf32>
    %135 = tpu.matmul %134, %125, %cst_82 {dimension_numbers = #tpu.dot_dimension_numbers<[1], [0], [0], [1], [0, 0, 1, 1], [], []>} : vector<16x128xbf16>, vector<128x128xbf16>, vector<16x128xf32> -> vector<16x128xf32>
    %136 = arith.truncf %121 : vector<16x128xf32> to vector<16x128xbf16>
    %cst_83 = arith.constant dense<0.000000e+00> : vector<16x128xf32>
    %137 = tpu.matmul %136, %127, %cst_83 {dimension_numbers = #tpu.dot_dimension_numbers<[1], [0], [0], [1], [0, 0, 1, 1], [], []>} : vector<16x128xbf16>, vector<128x128xbf16>, vector<16x128xf32> -> vector<16x128xf32>
    %138 = arith.truncf %133 : vector<16x128xf32> to vector<16x128xbf16>
    %139 = arith.truncf %135 : vector<16x128xf32> to vector<16x128xbf16>
    %140 = tpu.transpose %139, [1, 0] : vector<16x128xbf16> -> vector<128x16xbf16>
    %cst_84 = arith.constant dense<0.000000e+00> : vector<16x16xf32>
    %141 = tpu.matmul %138, %140, %cst_84 {dimension_numbers = #tpu.dot_dimension_numbers<[1], [0], [0], [1], [0, 0, 1, 1], [], []>} : vector<16x128xbf16>, vector<128x16xbf16>, vector<16x16xf32> -> vector<16x16xf32>
    %142 = arith.addf %141, %12 : vector<16x16xf32>
    %cst_85 = arith.constant dense<0xFF800000> : vector<16xf32>
    %143 = vector.multi_reduction <maximumf>, %142, %cst_85 [1] : vector<16x16xf32> to vector<16xf32>
    %144 = vector.shape_cast %143 : vector<16xf32> to vector<16x1xf32>
    %145 = vector.broadcast %144 : vector<16x1xf32> to vector<16x16xf32>
    %146 = arith.subf %142, %145 : vector<16x16xf32>
    %147 = math.exp %146 : vector<16x16xf32>
    %cst_86 = arith.constant dense<0.000000e+00> : vector<16xf32>
    %148 = vector.multi_reduction <add>, %147, %cst_86 [1] : vector<16x16xf32> to vector<16xf32>
    %149 = vector.shape_cast %148 : vector<16xf32> to vector<16x1xf32>
    %150 = tpu.reciprocal %149 {approx = true} : vector<16x1xf32> -> vector<16x1xf32>
    %151 = vector.broadcast %150 : vector<16x1xf32> to vector<16x16xf32>
    %152 = arith.mulf %147, %151 : vector<16x16xf32>
    %153 = arith.truncf %152 : vector<16x16xf32> to vector<16x16xbf16>
    %154 = arith.truncf %137 : vector<16x128xf32> to vector<16x128xbf16>
    %cst_87 = arith.constant dense<0.000000e+00> : vector<16x128xf32>
    %155 = tpu.matmul %153, %154, %cst_87 {dimension_numbers = #tpu.dot_dimension_numbers<[1], [0], [0], [1], [0, 0, 1, 1], [], []>} : vector<16x16xbf16>, vector<16x128xbf16>, vector<16x128xf32> -> vector<16x128xf32>
    %156 = arith.truncf %155 : vector<16x128xf32> to vector<16x128xbf16>
    %cst_88 = arith.constant dense<0.000000e+00> : vector<16x128xf32>
    %157 = tpu.matmul %156, %129, %cst_88 {dimension_numbers = #tpu.dot_dimension_numbers<[1], [0], [0], [1], [0, 0, 1, 1], [], []>} : vector<16x128xbf16>, vector<128x128xbf16>, vector<16x128xf32> -> vector<16x128xf32>
    %158 = arith.addf %121, %157 : vector<16x128xf32>
    %c2_89 = arith.constant 2 : index
    %c0_90 = arith.constant 0 : index
    %159 = vector.load %arg9[%c2_89, %c0_90] : memref<5x128xf32, #tpu.memory_space<vmem>>, vector<1x128xf32>
    %c2_91 = arith.constant 2 : index
    %c0_92 = arith.constant 0 : index
    %160 = vector.load %arg10[%c2_91, %c0_92] : memref<5x128xf32, #tpu.memory_space<vmem>>, vector<1x128xf32>
    %cst_93 = arith.constant dense<0.000000e+00> : vector<16xf32>
    %161 = vector.multi_reduction <add>, %158, %cst_93 [1] : vector<16x128xf32> to vector<16xf32>
    %162 = vector.shape_cast %161 : vector<16xf32> to vector<16x1xf32>
    %cst_94 = arith.constant 1.280000e+02 : f32
    %163 = vector.broadcast %cst_94 : f32 to vector<16x1xf32>
    %164 = arith.divf %162, %163 : vector<16x1xf32>
    %165 = arith.mulf %158, %158 : vector<16x128xf32>
    %cst_95 = arith.constant dense<0.000000e+00> : vector<16xf32>
    %166 = vector.multi_reduction <add>, %165, %cst_95 [1] : vector<16x128xf32> to vector<16xf32>
    %167 = vector.shape_cast %166 : vector<16xf32> to vector<16x1xf32>
    %cst_96 = arith.constant 1.280000e+02 : f32
    %168 = vector.broadcast %cst_96 : f32 to vector<16x1xf32>
    %169 = arith.divf %167, %168 : vector<16x1xf32>
    %170 = arith.mulf %164, %164 : vector<16x1xf32>
    %171 = arith.subf %169, %170 : vector<16x1xf32>
    %172 = vector.broadcast %164 : vector<16x1xf32> to vector<16x128xf32>
    %173 = arith.subf %158, %172 : vector<16x128xf32>
    %cst_97 = arith.constant 9.99999974E-6 : f32
    %174 = vector.broadcast %cst_97 : f32 to vector<16x1xf32>
    %175 = arith.addf %171, %174 : vector<16x1xf32>
    %176 = math.rsqrt %175 : vector<16x1xf32>
    %177 = vector.broadcast %176 : vector<16x1xf32> to vector<16x128xf32>
    %178 = arith.mulf %173, %177 : vector<16x128xf32>
    %179 = vector.broadcast %159 : vector<1x128xf32> to vector<16x128xf32>
    %180 = arith.mulf %178, %179 : vector<16x128xf32>
    %181 = vector.broadcast %160 : vector<1x128xf32> to vector<16x128xf32>
    %182 = arith.addf %180, %181 : vector<16x128xf32>
    %c2_98 = arith.constant 2 : index
    %c0_99 = arith.constant 0 : index
    %c0_100 = arith.constant 0 : index
    %c0_101 = arith.constant 0 : index
    %183 = vector.load %arg4[%c2_98, %c0_99, %c0_100, %c0_101] : memref<3x4x128x128xbf16, #tpu.memory_space<vmem>>, vector<1x1x128x128xbf16>
    %184 = vector.shape_cast %183 : vector<1x1x128x128xbf16> to vector<128x128xbf16>
    %c2_102 = arith.constant 2 : index
    %c1_103 = arith.constant 1 : index
    %c0_104 = arith.constant 0 : index
    %c0_105 = arith.constant 0 : index
    %185 = vector.load %arg4[%c2_102, %c1_103, %c0_104, %c0_105] : memref<3x4x128x128xbf16, #tpu.memory_space<vmem>>, vector<1x1x128x128xbf16>
    %186 = vector.shape_cast %185 : vector<1x1x128x128xbf16> to vector<128x128xbf16>
    %c2_106 = arith.constant 2 : index
    %c2_107 = arith.constant 2 : index
    %c0_108 = arith.constant 0 : index
    %c0_109 = arith.constant 0 : index
    %187 = vector.load %arg4[%c2_106, %c2_107, %c0_108, %c0_109] : memref<3x4x128x128xbf16, #tpu.memory_space<vmem>>, vector<1x1x128x128xbf16>
    %188 = vector.shape_cast %187 : vector<1x1x128x128xbf16> to vector<128x128xbf16>
    %c2_110 = arith.constant 2 : index
    %c3_111 = arith.constant 3 : index
    %c0_112 = arith.constant 0 : index
    %c0_113 = arith.constant 0 : index
    %189 = vector.load %arg4[%c2_110, %c3_111, %c0_112, %c0_113] : memref<3x4x128x128xbf16, #tpu.memory_space<vmem>>, vector<1x1x128x128xbf16>
    %190 = vector.shape_cast %189 : vector<1x1x128x128xbf16> to vector<128x128xbf16>
    %191 = arith.truncf %182 : vector<16x128xf32> to vector<16x128xbf16>
    %cst_114 = arith.constant dense<0.000000e+00> : vector<16x128xf32>
    %192 = tpu.matmul %191, %184, %cst_114 {dimension_numbers = #tpu.dot_dimension_numbers<[1], [0], [0], [1], [0, 0, 1, 1], [], []>} : vector<16x128xbf16>, vector<128x128xbf16>, vector<16x128xf32> -> vector<16x128xf32>
    %cst_115 = arith.constant 0.0883883461 : f32
    %193 = vector.broadcast %cst_115 : f32 to vector<16x128xf32>
    %194 = arith.mulf %192, %193 : vector<16x128xf32>
    %195 = arith.truncf %118 : vector<16x128xf32> to vector<16x128xbf16>
    %cst_116 = arith.constant dense<0.000000e+00> : vector<16x128xf32>
    %196 = tpu.matmul %195, %186, %cst_116 {dimension_numbers = #tpu.dot_dimension_numbers<[1], [0], [0], [1], [0, 0, 1, 1], [], []>} : vector<16x128xbf16>, vector<128x128xbf16>, vector<16x128xf32> -> vector<16x128xf32>
    %197 = arith.truncf %118 : vector<16x128xf32> to vector<16x128xbf16>
    %cst_117 = arith.constant dense<0.000000e+00> : vector<16x128xf32>
    %198 = tpu.matmul %197, %188, %cst_117 {dimension_numbers = #tpu.dot_dimension_numbers<[1], [0], [0], [1], [0, 0, 1, 1], [], []>} : vector<16x128xbf16>, vector<128x128xbf16>, vector<16x128xf32> -> vector<16x128xf32>
    %199 = arith.truncf %194 : vector<16x128xf32> to vector<16x128xbf16>
    %200 = arith.truncf %196 : vector<16x128xf32> to vector<16x128xbf16>
    %201 = tpu.transpose %200, [1, 0] : vector<16x128xbf16> -> vector<128x16xbf16>
    %cst_118 = arith.constant dense<0.000000e+00> : vector<16x16xf32>
    %202 = tpu.matmul %199, %201, %cst_118 {dimension_numbers = #tpu.dot_dimension_numbers<[1], [0], [0], [1], [0, 0, 1, 1], [], []>} : vector<16x128xbf16>, vector<128x16xbf16>, vector<16x16xf32> -> vector<16x16xf32>
    %203 = vector.broadcast %6 : vector<1x16xf32> to vector<16x16xf32>
    %204 = arith.addf %202, %203 : vector<16x16xf32>
    %cst_119 = arith.constant dense<0xFF800000> : vector<16xf32>
    %205 = vector.multi_reduction <maximumf>, %204, %cst_119 [1] : vector<16x16xf32> to vector<16xf32>
    %206 = vector.shape_cast %205 : vector<16xf32> to vector<16x1xf32>
    %207 = vector.broadcast %206 : vector<16x1xf32> to vector<16x16xf32>
    %208 = arith.subf %204, %207 : vector<16x16xf32>
    %209 = math.exp %208 : vector<16x16xf32>
    %cst_120 = arith.constant dense<0.000000e+00> : vector<16xf32>
    %210 = vector.multi_reduction <add>, %209, %cst_120 [1] : vector<16x16xf32> to vector<16xf32>
    %211 = vector.shape_cast %210 : vector<16xf32> to vector<16x1xf32>
    %212 = tpu.reciprocal %211 {approx = true} : vector<16x1xf32> -> vector<16x1xf32>
    %213 = vector.broadcast %212 : vector<16x1xf32> to vector<16x16xf32>
    %214 = arith.mulf %209, %213 : vector<16x16xf32>
    %215 = arith.truncf %214 : vector<16x16xf32> to vector<16x16xbf16>
    %216 = arith.truncf %198 : vector<16x128xf32> to vector<16x128xbf16>
    %cst_121 = arith.constant dense<0.000000e+00> : vector<16x128xf32>
    %217 = tpu.matmul %215, %216, %cst_121 {dimension_numbers = #tpu.dot_dimension_numbers<[1], [0], [0], [1], [0, 0, 1, 1], [], []>} : vector<16x16xbf16>, vector<16x128xbf16>, vector<16x128xf32> -> vector<16x128xf32>
    %218 = arith.truncf %217 : vector<16x128xf32> to vector<16x128xbf16>
    %cst_122 = arith.constant dense<0.000000e+00> : vector<16x128xf32>
    %219 = tpu.matmul %218, %190, %cst_122 {dimension_numbers = #tpu.dot_dimension_numbers<[1], [0], [0], [1], [0, 0, 1, 1], [], []>} : vector<16x128xbf16>, vector<128x128xbf16>, vector<16x128xf32> -> vector<16x128xf32>
    %220 = arith.addf %182, %219 : vector<16x128xf32>
    %c3_123 = arith.constant 3 : index
    %c0_124 = arith.constant 0 : index
    %221 = vector.load %arg9[%c3_123, %c0_124] : memref<5x128xf32, #tpu.memory_space<vmem>>, vector<1x128xf32>
    %c3_125 = arith.constant 3 : index
    %c0_126 = arith.constant 0 : index
    %222 = vector.load %arg10[%c3_125, %c0_126] : memref<5x128xf32, #tpu.memory_space<vmem>>, vector<1x128xf32>
    %cst_127 = arith.constant dense<0.000000e+00> : vector<16xf32>
    %223 = vector.multi_reduction <add>, %220, %cst_127 [1] : vector<16x128xf32> to vector<16xf32>
    %224 = vector.shape_cast %223 : vector<16xf32> to vector<16x1xf32>
    %cst_128 = arith.constant 1.280000e+02 : f32
    %225 = vector.broadcast %cst_128 : f32 to vector<16x1xf32>
    %226 = arith.divf %224, %225 : vector<16x1xf32>
    %227 = arith.mulf %220, %220 : vector<16x128xf32>
    %cst_129 = arith.constant dense<0.000000e+00> : vector<16xf32>
    %228 = vector.multi_reduction <add>, %227, %cst_129 [1] : vector<16x128xf32> to vector<16xf32>
    %229 = vector.shape_cast %228 : vector<16xf32> to vector<16x1xf32>
    %cst_130 = arith.constant 1.280000e+02 : f32
    %230 = vector.broadcast %cst_130 : f32 to vector<16x1xf32>
    %231 = arith.divf %229, %230 : vector<16x1xf32>
    %232 = arith.mulf %226, %226 : vector<16x1xf32>
    %233 = arith.subf %231, %232 : vector<16x1xf32>
    %234 = vector.broadcast %226 : vector<16x1xf32> to vector<16x128xf32>
    %235 = arith.subf %220, %234 : vector<16x128xf32>
    %cst_131 = arith.constant 9.99999974E-6 : f32
    %236 = vector.broadcast %cst_131 : f32 to vector<16x1xf32>
    %237 = arith.addf %233, %236 : vector<16x1xf32>
    %238 = math.rsqrt %237 : vector<16x1xf32>
    %239 = vector.broadcast %238 : vector<16x1xf32> to vector<16x128xf32>
    %240 = arith.mulf %235, %239 : vector<16x128xf32>
    %241 = vector.broadcast %221 : vector<1x128xf32> to vector<16x128xf32>
    %242 = arith.mulf %240, %241 : vector<16x128xf32>
    %243 = vector.broadcast %222 : vector<1x128xf32> to vector<16x128xf32>
    %244 = arith.addf %242, %243 : vector<16x128xf32>
    %c1_132 = arith.constant 1 : index
    %c0_133 = arith.constant 0 : index
    %c0_134 = arith.constant 0 : index
    %245 = vector.load %arg5[%c1_132, %c0_133, %c0_134] : memref<2x128x256xbf16, #tpu.memory_space<vmem>>, vector<1x128x256xbf16>
    %246 = vector.shape_cast %245 : vector<1x128x256xbf16> to vector<128x256xbf16>
    %c1_135 = arith.constant 1 : index
    %c0_136 = arith.constant 0 : index
    %c0_137 = arith.constant 0 : index
    %247 = vector.load %arg7[%c1_135, %c0_136, %c0_137] : memref<2x256x128xbf16, #tpu.memory_space<vmem>>, vector<1x256x128xbf16>
    %248 = vector.shape_cast %247 : vector<1x256x128xbf16> to vector<256x128xbf16>
    %c1_138 = arith.constant 1 : index
    %c0_139 = arith.constant 0 : index
    %249 = vector.load %arg6[%c1_138, %c0_139] : memref<2x256xf32, #tpu.memory_space<vmem>>, vector<1x256xf32>
    %c1_140 = arith.constant 1 : index
    %c0_141 = arith.constant 0 : index
    %250 = vector.load %arg8[%c1_140, %c0_141] : memref<2x128xf32, #tpu.memory_space<vmem>>, vector<1x128xf32>
    %251 = arith.truncf %244 : vector<16x128xf32> to vector<16x128xbf16>
    %cst_142 = arith.constant dense<0.000000e+00> : vector<16x256xf32>
    %252 = tpu.matmul %251, %246, %cst_142 {dimension_numbers = #tpu.dot_dimension_numbers<[1], [0], [0], [1], [0, 0, 1, 1], [], []>} : vector<16x128xbf16>, vector<128x256xbf16>, vector<16x256xf32> -> vector<16x256xf32>
    %253 = vector.broadcast %249 : vector<1x256xf32> to vector<16x256xf32>
    %254 = arith.addf %252, %253 : vector<16x256xf32>
    %cst_143 = arith.constant 0.000000e+00 : f32
    %255 = vector.broadcast %cst_143 : f32 to vector<16x256xf32>
    %256 = arith.maximumf %254, %255 : vector<16x256xf32>
    %257 = arith.truncf %256 : vector<16x256xf32> to vector<16x256xbf16>
    %cst_144 = arith.constant dense<0.000000e+00> : vector<16x128xf32>
    %258 = tpu.matmul %257, %248, %cst_144 {dimension_numbers = #tpu.dot_dimension_numbers<[1], [0], [0], [1], [0, 0, 1, 1], [], []>} : vector<16x256xbf16>, vector<256x128xbf16>, vector<16x128xf32> -> vector<16x128xf32>
    %259 = vector.broadcast %250 : vector<1x128xf32> to vector<16x128xf32>
    %260 = arith.addf %258, %259 : vector<16x128xf32>
    %261 = arith.addf %244, %260 : vector<16x128xf32>
    %c4 = arith.constant 4 : index
    %c0_145 = arith.constant 0 : index
    %262 = vector.load %arg9[%c4, %c0_145] : memref<5x128xf32, #tpu.memory_space<vmem>>, vector<1x128xf32>
    %c4_146 = arith.constant 4 : index
    %c0_147 = arith.constant 0 : index
    %263 = vector.load %arg10[%c4_146, %c0_147] : memref<5x128xf32, #tpu.memory_space<vmem>>, vector<1x128xf32>
    %cst_148 = arith.constant dense<0.000000e+00> : vector<16xf32>
    %264 = vector.multi_reduction <add>, %261, %cst_148 [1] : vector<16x128xf32> to vector<16xf32>
    %265 = vector.shape_cast %264 : vector<16xf32> to vector<16x1xf32>
    %cst_149 = arith.constant 1.280000e+02 : f32
    %266 = vector.broadcast %cst_149 : f32 to vector<16x1xf32>
    %267 = arith.divf %265, %266 : vector<16x1xf32>
    %268 = arith.mulf %261, %261 : vector<16x128xf32>
    %cst_150 = arith.constant dense<0.000000e+00> : vector<16xf32>
    %269 = vector.multi_reduction <add>, %268, %cst_150 [1] : vector<16x128xf32> to vector<16xf32>
    %270 = vector.shape_cast %269 : vector<16xf32> to vector<16x1xf32>
    %cst_151 = arith.constant 1.280000e+02 : f32
    %271 = vector.broadcast %cst_151 : f32 to vector<16x1xf32>
    %272 = arith.divf %270, %271 : vector<16x1xf32>
    %273 = arith.mulf %267, %267 : vector<16x1xf32>
    %274 = arith.subf %272, %273 : vector<16x1xf32>
    %275 = vector.broadcast %267 : vector<16x1xf32> to vector<16x128xf32>
    %276 = arith.subf %261, %275 : vector<16x128xf32>
    %cst_152 = arith.constant 9.99999974E-6 : f32
    %277 = vector.broadcast %cst_152 : f32 to vector<16x1xf32>
    %278 = arith.addf %274, %277 : vector<16x1xf32>
    %279 = math.rsqrt %278 : vector<16x1xf32>
    %280 = vector.broadcast %279 : vector<16x1xf32> to vector<16x128xf32>
    %281 = arith.mulf %276, %280 : vector<16x128xf32>
    %282 = vector.broadcast %262 : vector<1x128xf32> to vector<16x128xf32>
    %283 = arith.mulf %281, %282 : vector<16x128xf32>
    %284 = vector.broadcast %263 : vector<1x128xf32> to vector<16x128xf32>
    %285 = arith.addf %283, %284 : vector<16x128xf32>
    %286 = arith.truncf %285 : vector<16x128xf32> to vector<16x128xbf16>
    %c0_153 = arith.constant 0 : index
    %c0_154 = arith.constant 0 : index
    %c0_155 = arith.constant 0 : index
    %287 = vector.load %arg11[%c0_153, %c0_154, %c0_155] : memref<1x16x128xbf16, #tpu.memory_space<vmem>>, vector<1x16x128xbf16>
    %288 = vector.shape_cast %287 : vector<1x16x128xbf16> to vector<16x128xbf16>
    %289 = vector.shape_cast %286 : vector<16x128xbf16> to vector<1x16x128xbf16>
    tpu.vector_store %arg11[%c0_153, %c0_154, %c0_155], %289 {strides = array<i32>} : memref<1x16x128xbf16, #tpu.memory_space<vmem>>, vector<1x16x128xbf16>,
    return
  }
  func.func @transform_0(%arg0: i32) -> (i32, i32, i32) {
    %c0_i32 = arith.constant 0 : i32
    %c0_i32_0 = arith.constant 0 : i32
    %c0_i32_1 = arith.constant 0 : i32
    return %arg0, %c0_i32, %c0_i32_0 : i32, i32, i32
  }
  func.func @transform_1(%arg0: i32) -> (i32, i32, i32) {
    %c0_i32 = arith.constant 0 : i32
    %c0_i32_0 = arith.constant 0 : i32
    %c0_i32_1 = arith.constant 0 : i32
    return %arg0, %c0_i32, %c0_i32_0 : i32, i32, i32
  }
  func.func @transform_2(%arg0: i32) -> (i32, i32, i32) {
    %c0_i32 = arith.constant 0 : i32
    %c0_i32_0 = arith.constant 0 : i32
    %c0_i32_1 = arith.constant 0 : i32
    return %arg0, %c0_i32, %c0_i32_0 : i32, i32, i32
  }
  func.func @transform_3(%arg0: i32) -> (i32, i32, i32, i32) {
    %c0_i32 = arith.constant 0 : i32
    %c0_i32_0 = arith.constant 0 : i32
    %c0_i32_1 = arith.constant 0 : i32
    %c0_i32_2 = arith.constant 0 : i32
    %c0_i32_3 = arith.constant 0 : i32
    return %c0_i32, %c0_i32_0, %c0_i32_1, %c0_i32_2 : i32, i32, i32, i32
  }
  func.func @transform_4(%arg0: i32) -> (i32, i32, i32) {
    %c0_i32 = arith.constant 0 : i32
    %c0_i32_0 = arith.constant 0 : i32
    %c0_i32_1 = arith.constant 0 : i32
    %c0_i32_2 = arith.constant 0 : i32
    return %c0_i32, %c0_i32_0, %c0_i32_1 : i32, i32, i32
  }
  func.func @transform_5(%arg0: i32) -> (i32, i32) {
    %c0_i32 = arith.constant 0 : i32
    %c0_i32_0 = arith.constant 0 : i32
    %c0_i32_1 = arith.constant 0 : i32
    return %c0_i32, %c0_i32_0 : i32, i32
  }
  func.func @transform_6(%arg0: i32) -> (i32, i32, i32) {
    %c0_i32 = arith.constant 0 : i32
    %c0_i32_0 = arith.constant 0 : i32
    %c0_i32_1 = arith.constant 0 : i32
    %c0_i32_2 = arith.constant 0 : i32
    return %c0_i32, %c0_i32_0, %c0_i32_1 : i32, i32, i32
  }
  func.func @transform_7(%arg0: i32) -> (i32, i32) {
    %c0_i32 = arith.constant 0 : i32
    %c0_i32_0 = arith.constant 0 : i32
    %c0_i32_1 = arith.constant 0 : i32
    return %c0_i32, %c0_i32_0 : i32, i32
  }
  func.func @transform_8(%arg0: i32) -> (i32, i32) {
    %c0_i32 = arith.constant 0 : i32
    %c0_i32_0 = arith.constant 0 : i32
    %c0_i32_1 = arith.constant 0 : i32
    return %c0_i32, %c0_i32_0 : i32, i32
  }
  func.func @transform_9(%arg0: i32) -> (i32, i32) {
    %c0_i32 = arith.constant 0 : i32
    %c0_i32_0 = arith.constant 0 : i32
    %c0_i32_1 = arith.constant 0 : i32
    return %c0_i32, %c0_i32_0 : i32, i32
  }
  func.func @transform_10(%arg0: i32) -> (i32, i32, i32) {
    %c0_i32 = arith.constant 0 : i32
    %c0_i32_0 = arith.constant 0 : i32
    %c0_i32_1 = arith.constant 0 : i32
    return %arg0, %c0_i32, %c0_i32_0 : i32, i32, i32
  }
}

</mosaic_0001>

<bundles_post_ra>
// kernel: tpu_custom_call.1
= control target key start
LH: loop header
LB: loop body
LE: loop exit
PB: predicated region body
PF: predicated region fallthrough
CT: control target
= control target key end

     0   :  { %s5221_s0 = inlined_call_operand.hbm [shape: s32[2,1,16], index: 0, kind: input, shape index: {}]   ;;  %s5222_s1 = inlined_call_operand.hbm [shape: bf16[2,16,128], index: 1, kind: input, shape index: {}]   ;;  %s5223_s2 = inlined_call_operand.hbm [shape: bf16[2,16,128], index: 2, kind: input, shape index: {}]   ;;  %s5224_s3 = inlined_call_operand.hbm [shape: bf16[3,4,128,128], index: 3, kind: input, shape index: {}]   ;;  %s5225_s4 = inlined_call_operand.hbm [shape: bf16[2,128,256], index: 4, kind: input, shape index: {}]   ;;  %s5226_s5 = inlined_call_operand.hbm [shape: f32[2,256], index: 5, kind: input, shape index: {}]   ;;  %s5227_s6 = inlined_call_operand.hbm [shape: bf16[2,256,128], index: 6, kind: input, shape index: {}]   ;;  %s5228_s7 = inlined_call_operand.hbm [shape: f32[2,128], index: 7, kind: input, shape index: {}]   ;;  %s5229_s8 = inlined_call_operand.vmem [shape: f32[5,128], index: 8, kind: input, shape index: {}]   ;;  %s5230_s9 = inlined_call_operand.vmem [shape: f32[5,128], index: 9, kind: input, shape index: {}]   ;;  %s5231_s10 = inlined_call_operand.hbm [shape: bf16[2,16,128], index: 10, kind: output, shape index: {}]  }
   0x1   :  { %5256 = sst [smem:[#allocation29_spill]] %s5222_s1 }
   0x2   :  { %5257 = sst [smem:[#allocation30_spill]] %s5224_s3 }
   0x3   :  { %5258 = sst [smem:[#allocation31_spill]] %s5226_s5 }
   0x4   :  { %5259 = sst [smem:[#allocation32_spill]] %s5229_s8 }
   0x5   :  { %5260 = sst [smem:[#allocation33_spill]] %s5230_s9 }
   0x6   :  { %5261 = sst [smem:[#allocation34_spill]] %s5231_s10 }
   0x7   :  { %15 = vsyncpa [#allocation3], 0 }
   0x8   :  { %17 = vsyncpa [#allocation3 + $0x1], 0 }
   0x9   :  { %18 = vsyncpa [#allocation6], 0 }
   0xa   :  { %20 = vsyncpa [#allocation6 + $0x1], 0 }
   0xb   :  { %21 = vsyncpa [#allocation9], 0 }
   0xc   :  { %22 = vsyncpa [#allocation12], 0 }
   0xd   :  { %23 = vsyncpa [#allocation15], 0 }
   0xe   :  { %24 = vsyncpa [#allocation4], 0 }
   0xf   :  { %26 = vsyncpa [#allocation4 + $0x1], 0  ;;  %s4605_s13 = smov 0   ;;  %s4607_s14 = smov 0  }
  0x10   :  { %s4609_s15 = smov 0   ;;  %s4611_s16 = smov 0  }
  0x11 LB: > { %5262 = sst [smem:[#allocation23_spill]] %s4517_s13  ;;  %s4531_s17 = smov [#allocation8]   ;;  %s4529_s16 = sphi %s4611_s16, %s5302_s16   ;;  %s4525_s15 = sphi %s4609_s15, %s5304_s15   ;;  %s4521_s14 = sphi %s4607_s14, %s5306_s14   ;;  %s4517_s13 = sphi %s4605_s13, %s5305_s13  }
  0x12   : > { %5263 = sst [smem:[#allocation24_spill]] %s4525_s15  ;;  %s300_s18 = sshll.u32 %s4531_s17, 4  ;;  %s301_s18 = int_to_ptr.vmem [resolvable:$true] %s300_s18 }
  0x13   : > { %s4626_s19 = sadd.s32 4294967295, %s4529_s16   ;;  %p3237_p0 = scmp.ge.s32.totalorder %s4529_s16, 1 }
  0x14   : > { %p5243_p1 = scmp.eq.s32.totalorder %s4626_s19, 0  ;;  %p275_p2 = scmp.eq.s32.totalorder %s4626_s19, 1 }
  0x15   : > { %p288_p3 = scmp.lt.s32.totalorder %s4529_s16, 3  ;;  %s4532_s21 = smov [#allocation11]  }
  0x16   : > { %s327_s22 = sshll.u32 %s4532_s21, 4  ;;  %s4246_s25 = scalar_lea.vmem %s301_s18, 12288  ;;  %s328_s22 = int_to_ptr.vmem [resolvable:$true] %s327_s22 }
  0x17   : > { %p4632_p4 = pnand %p3237_p0, %p288_p3  ;;  %p4247_p9 = scmp.ne.s32.totalorder %s301_s18, %s4246_s25 }
  0x18   : > { %p4254_p12 = scmp.lt.s32.totalorder %s301_s18, %s301_s18  ;;  %p4255_p13 = scmp.lt.s32.totalorder %s4246_s25, %s4246_s25 }
  0x19   : > { %s5264_s20 = scalar_select %p4632_p4, 1, 0 }
  0x1a   : > { %p3922_p6 = pneg %p4632_p4  ;;  %p4256_p0 = por %p4255_p13, %p4254_p12 }
  0x1c   : > { %p4641_p7 = pnand %p3922_p6, %p5243_p1 }
  0x1e   : > { %s5265_s23 = scalar_select %p4641_p7, 1, 0 }
  0x1f   : > { %p4647_p8 = pneg %p4641_p7 }
  0x21   : > { %s5266_s24 = scalar_select %p4647_p8, 1, 0 }
  0x22   : > { %p4249_p10 = pnand %p4247_p9, %p4647_p8 }
  0x24   : > { %p4250_p11 = pneg %p4249_p10 }
  0x26   : > { %p4257_p3 = pnand %p4256_p0, %p4250_p11 }
  0x28   : > { %4260 = shalt.err (!%p4257_p3)
}
  0x29   : > { %s5233_s26 = smov 64   ;;  %s5235_s27 = smov 4  }
  0x2a   : > { %s5267_s3 = sld [smem:[#allocation30_spill]]  ;;  %s4272_s30 = scalar_lea.vmem %s328_s22, 64 }
  0x2b   : > { %p4273_p6 = scmp.ne.s32.totalorder %s328_s22, %s4272_s30  ;;  %p4280_p12 = scmp.lt.s32.totalorder %s328_s22, %s328_s22 }
  0x2c   : > { %p4281_p11 = scmp.lt.s32.totalorder %s4272_s30, %s4272_s30 }
  0x2d   : > { %p4275_p9 = pnand %p4273_p6, %p4647_p8 }
  0x2e   : > { %p4282_p13 = por %p4281_p11, %p4280_p12 }
  0x2f   : > { %p4276_p10 = pneg %p4275_p9 }
  0x30   : > { %3925 = dma.hbm_to_vmem [thread:$0]  (!%p4641_p7), %s5267_s3, 12288, %s301_s18, [#allocation9], %s5233_s26, %s5233_s26, %s5235_s27  }
  0x31   : > { %p4283_p0 = pnand %p4282_p13, %p4276_p10 }
  0x33   : > { %4286 = shalt.err (!%p4283_p0)
}
  0x34   : > { %s5268_s5 = sld [smem:[#allocation31_spill]]  ;;  %s3236_s17 = sadd.s32 4294967294, %s4529_s16  }
  0x35   : > { %s4670_s18 = sadd.s32 1, %s4529_s16   ;;  %s39_s21 = sadd.s32 1, %s4525_s15 }
  0x36   : > { %5269 = sst [smem:[#allocation25_spill]] %s4670_s18  ;;  %s36_s25 = ssub.s32 %s4529_s16, %s4670_s18 }
  0x37   : > { %p46_p3 = scmp.ne.s32.totalorder %s4525_s15, %s4521_s14  ;;  %p37_p6 = scmp.eq.s32.totalorder %s36_s25, 0 }
  0x38   : > { %p47_p9 = scmp.eq.s32.totalorder %s4529_s16, 0  ;;  %p52_p10 = scmp.ne.s32.totalorder %s4521_s14, %s4517_s13 }
  0x39   : > { %p4682_p12 = por %p275_p2, %p46_p3  ;;  %p281_p0 = scmp.eq.s32.totalorder %s3236_s17, 1 }
  0x3a   : > { %3931 = dma.hbm_to_vmem [thread:$0]  (!%p4641_p7), %s5268_s5, 64, %s328_s22, [#allocation12]  }
  0x3b   : > { %s5270_s28 = scalar_select %p4682_p12, 1, 0 }
  0x3c   : > { %s4687_s29 = scalar_select %p37_p6, %s4525_s15, %s39_s21  }
  0x3d   : > { %5271 = sst [smem:[#allocation26_spill]] %s5270_s28  ;;  %p48_p11 = por %p47_p9, %p46_p3 }
  0x3e   : > { %5272 = sst [smem:[#allocation27_spill]] %s4687_s29  ;;  %p4691_p13 = por %p5243_p1, %p52_p10 }
  0x3f   : > { %p3957_p5 = scmp.lt.s32.totalorder %s4529_s16, 2  ;;  %s4697_s30 = sand.u32 1, %s4525_s15  }
  0x40   : > { %s5273_s22 = scalar_select %p4691_p13, 1, 0 }
  0x41   : > { %s385_s11 = sand.u32 1, %s4529_s16   ;;  %p4700_p4 = por %p281_p0, %p52_p10 }
  0x42   : > { %p4704_p2 = pnand %p3957_p5, %p48_p11  ;;  %s5241_s25 = sshll.u32 %s4697_s30, 3 }
  0x43   : > { %s5274_s12 = scalar_select %p4700_p4, 1, 0 }
  0x44   : > { %s5242_s26 = sshll.u32 %s4529_s16, 7  ;;  %s389_s27 = scalar_lea.vmem [#allocation5], %s5241_s25 }
  0x45   : > { %5275 = sst [smem:[#allocation28_spill]] %s5274_s12  ;;  %s396_s17 = sshll.u32 %s389_s27, 4  ;;  %s4719_s17 = int_to_ptr.vmem [resolvable:$true] %s396_s17 }
  0x46   : > { %s5277_s1 = sld [smem:[#allocation29_spill]]  ;;  %s4721_s15 = scalar_lea.sflag [#allocation6], %s385_s11 }
  0x47   : > { %p4727_p3 = pneg %p4704_p2 }
  0x4c   : > { %s4717_s29 = scalar_lea.hbm %s5277_s1, %s5242_s26  ;;  %s4292_s27 = scalar_lea.hbm %s5277_s1, 256 }
  0x4d   : > { %s4287_s18 = scalar_lea.hbm %s4717_s29, 128  ;;  %p4293_p10 = scmp.lt.s32.totalorder %s4717_s29, %s5277_s1 }
  0x4e   : > { %p4288_p5 = scmp.ne.s32.totalorder %s4717_s29, %s4287_s18  ;;  %p4294_p11 = scmp.lt.s32.totalorder %s4292_s27, %s4287_s18 }
  0x50   : > { %p4290_p6 = pnand %p4727_p3, %p4288_p5  ;;  %p4295_p0 = por %p4294_p11, %p4293_p10 }
  0x52   : > { %p4291_p9 = pneg %p4290_p6 }
  0x54   : > { %p4296_p1 = pnand %p4295_p0, %p4291_p9 }
  0x56   : > { %4299 = shalt.err (!%p4296_p1)
}
  0x57   : > { %s4300_s11 = scalar_lea.vmem %s4719_s17, 128  ;;  %s4535_s13 = smov [#allocation5]  }
  0x58   : > { %p4301_p4 = scmp.ne.s32.totalorder %s4719_s17, %s4300_s11  ;;  %s4305_s3 = sshll.u32 %s4535_s13, 4  ;;  %s4306_s3 = int_to_ptr.vmem [resolvable:$false] %s4305_s3 }
  0x59   : > { %s4307_s5 = scalar_lea.vmem %s4306_s3, 256  ;;  %p4308_p12 = scmp.lt.s32.totalorder %s4719_s17, %s4306_s3 }
  0x5a   : > { %p4303_p5 = pnand %p4301_p4, %p4727_p3  ;;  %p4309_p13 = scmp.lt.s32.totalorder %s4307_s5, %s4300_s11 }
  0x5c   : > { %p4304_p6 = pneg %p4303_p5  ;;  %p4310_p7 = por %p4309_p13, %p4308_p12 }
  0x5e   : > { %p4311_p8 = pnand %p4310_p7, %p4304_p6 }
  0x60   : > { %4314 = shalt.err (!%p4311_p8)
}
  0x61   : > { %s5279_s26 = smov 4   ;;  %s5280_s18 = smov 64  }
  0x62   : > { %3944 = dma.hbm_to_vmem [thread:$0]  (!%p4704_p2), %s4717_s29, 128, %s4719_s17, %s4721_s15, %s5280_s18, %s5280_s18, %s5279_s26  }
  0x63   : > { %s5281_s13 = sshll.u32 %s4529_s16, 7  ;;  %s5282_s3 = sshll.u32 %s4697_s30, 3 }
  0x64   : > { %s4758_s11 = scalar_lea.hbm %s5223_s2, %s5281_s13  ;;  %s410_s5 = scalar_lea.vmem [#allocation7], %s5282_s3 }
  0x65   : > { %s417_s1 = sshll.u32 %s410_s5, 4  ;;  %s4536_s10 = smov [#allocation10]   ;;  %s4762_s1 = int_to_ptr.vmem [resolvable:$true] %s417_s1 }
  0x66   : > { %s313_s28 = sshll.u32 %s4536_s10, 4  ;;  %p5283_p4 = scmp.ne.s32.totalorder %s5266_s24, 0  ;;  %s314_s28 = int_to_ptr.vmem [resolvable:$true] %s313_s28 }
  0x67   : > { %s4326_s9 = scalar_lea.vmem %s314_s28, 4096  ;;  %p4334_p12 = scmp.lt.s32.totalorder %s314_s28, %s314_s28 }
  0x68   : > { %p4327_p1 = scmp.ne.s32.totalorder %s314_s28, %s4326_s9  ;;  %p4335_p13 = scmp.lt.s32.totalorder %s4326_s9, %s4326_s9 }
  0x6a   : > { %p4329_p7 = pnand %p4327_p1, %p5283_p4  ;;  %p4336_p9 = por %p4335_p13, %p4334_p12 }
  0x6c   : > { %p4330_p8 = pneg %p4329_p7 }
  0x6e   : > { %p4337_p10 = pnand %p4336_p9, %p4330_p8 }
  0x70   : > { %4340 = shalt.err (!%p4337_p10)
}
  0x71   : > { %s4537_s29 = smov 128   ;;  %s4538_s17 = smov 8  }
  0x72   : > { %p5284_p11 = scmp.ne.s32.totalorder %s5265_s23, 0  ;;  %s4539_s10 = smov [#allocation13]  }
  0x73   : > { %s337_s27 = sshll.u32 %s4539_s10, 4  ;;  %s4540_s3 = smov [#allocation14]   ;;  %s338_s27 = int_to_ptr.vmem [resolvable:$true] %s337_s27 }
  0x74   : > { %3928 = dma.hbm_to_vmem [thread:$0]  (!%p5284_p11), %s5225_s4, 4096, %s314_s28, [#allocation9], %s4537_s29, %s4537_s29, %s4538_s17  }
  0x75   : > { %s351_s5 = sshll.u32 %s4540_s3, 4  ;;  %s4352_s8 = scalar_lea.vmem %s338_s27, 4096  ;;  %s352_s5 = int_to_ptr.vmem [resolvable:$true] %s351_s5 }
  0x76   : > { %p4353_p0 = scmp.ne.s32.totalorder %s338_s27, %s4352_s8  ;;  %p4360_p1 = scmp.lt.s32.totalorder %s338_s27, %s338_s27 }
  0x77   : > { %p4361_p7 = scmp.lt.s32.totalorder %s4352_s8, %s4352_s8 }
  0x78   : > { %p4355_p5 = pnand %p4353_p0, %p5283_p4 }
  0x79   : > { %p4362_p8 = por %p4361_p7, %p4360_p1 }
  0x7a   : > { %p4356_p6 = pneg %p4355_p5 }
  0x7c   : > { %p4363_p12 = pnand %p4362_p8, %p4356_p6 }
  0x7e   : > { %4366 = shalt.err (!%p4363_p12)
}
  0x7f   : > { %3934 = dma.hbm_to_vmem [thread:$0]  (!%p5284_p11), %s5227_s6, 4096, %s338_s27, [#allocation12], %s5280_s18, %s5280_s18, %s5279_s26  }
  0x80   : > { %s4378_s29 = scalar_lea.vmem %s352_s5, 32  ;;  %p4386_p0 = scmp.lt.s32.totalorder %s352_s5, %s352_s5 }
  0x81   : > { %p4379_p13 = scmp.ne.s32.totalorder %s352_s5, %s4378_s29  ;;  %p4387_p5 = scmp.lt.s32.totalorder %s4378_s29, %s4378_s29 }
  0x83   : > { %p4381_p9 = pnand %p4379_p13, %p5283_p4  ;;  %p4388_p6 = por %p4387_p5, %p4386_p0 }
  0x85   : > { %p4382_p10 = pneg %p4381_p9 }
  0x87   : > { %p4389_p1 = pnand %p4388_p6, %p4382_p10 }
  0x89   : > { %4392 = shalt.err (!%p4389_p1)
}
  0x8a   : > { %3937 = dma.hbm_to_vmem [thread:$0]  (!%p5284_p11), %s5228_s7, 32, %s352_s5, [#allocation15]  }
  0x8b   : > { %s3244_s13 = sshll.u32 %s4529_s16, 4  ;;  %s371_s27 = scalar_lea.vmem [#allocation2], %s4697_s30 }
  0x8c   : > { %s4792_s10 = scalar_lea.hbm %s5221_s0, %s3244_s13  ;;  %s378_s3 = sshll.u32 %s371_s27, 4  ;;  %s379_s3 = int_to_ptr.vmem [resolvable:$true] %s378_s3 }
  0x8d   : > { %s369_s23 = scalar_lea.sflag [#allocation3], %s4697_s30  ;;  %s4393_s9 = scalar_lea.hbm %s4792_s10, 16 }
  0x8e   : > { %p4394_p4 = scmp.ne.s32.totalorder %s4792_s10, %s4393_s9  ;;  %s4398_s29 = scalar_lea.hbm %s5221_s0, 32 }
  0x8f   : > { %p4399_p11 = scmp.lt.s32.totalorder %s4792_s10, %s5221_s0  ;;  %p4400_p12 = scmp.lt.s32.totalorder %s4398_s29, %s4393_s9 }
  0x90   : > { %p4396_p7 = pnand %p4394_p4, %p4727_p3 }
  0x91   : > { %p4401_p13 = por %p4400_p12, %p4399_p11 }
  0x92   : > { %p4397_p8 = pneg %p4396_p7 }
  0x94   : > { %p4402_p9 = pnand %p4401_p13, %p4397_p8 }
  0x96   : > { %4405 = shalt.err (!%p4402_p9)
}
  0x97   : > { %s4406_s13 = scalar_lea.vmem %s379_s3, 16  ;;  %s4541_s30 = smov [#allocation2]  }
  0x98   : > { %p4407_p10 = scmp.ne.s32.totalorder %s379_s3, %s4406_s13  ;;  %s4411_s25 = sshll.u32 %s4541_s30, 4  ;;  %s4412_s25 = int_to_ptr.vmem [resolvable:$false] %s4411_s25 }
  0x99   : > { %s4413_s24 = scalar_lea.vmem %s4412_s25, 32  ;;  %p4414_p6 = scmp.lt.s32.totalorder %s379_s3, %s4412_s25 }
  0x9a   : > { %p4409_p0 = pnand %p4407_p10, %p4727_p3  ;;  %p4415_p1 = scmp.lt.s32.totalorder %s4413_s24, %s4406_s13 }
  0x9c   : > { %p4410_p5 = pneg %p4409_p0  ;;  %p4416_p4 = por %p4415_p1, %p4414_p6 }
  0x9e   : > { %p4417_p7 = pnand %p4416_p4, %p4410_p5 }
  0xa0   : > { %4420 = shalt.err (!%p4417_p7)
}
  0xa1   : > { %3941 = dma.hbm_to_vmem [thread:$0]  (!%p4704_p2), %s4792_s10, 16, %s379_s3, %s369_s23  }
  0xa2   : > { %s4421_s27 = scalar_lea.hbm %s4758_s11, 128  ;;  %s4426_s5 = scalar_lea.hbm %s5223_s2, 256 }
  0xa3   : > { %p4422_p8 = scmp.ne.s32.totalorder %s4758_s11, %s4421_s27  ;;  %p4427_p13 = scmp.lt.s32.totalorder %s4758_s11, %s5223_s2 }
  0xa4   : > { %p4428_p9 = scmp.lt.s32.totalorder %s4426_s5, %s4421_s27 }
  0xa5   : > { %p4424_p11 = pnand %p4422_p8, %p4727_p3 }
  0xa6   : > { %p4429_p10 = por %p4428_p9, %p4427_p13 }
  0xa7   : > { %p4425_p12 = pneg %p4424_p11 }
  0xa9   : > { %p4430_p0 = pnand %p4429_p10, %p4425_p12 }
  0xab   : > { %4433 = shalt.err (!%p4430_p0)
}
  0xac   : > { %s4434_s10 = scalar_lea.vmem %s4762_s1, 128  ;;  %s4542_s3 = smov [#allocation7]  }
  0xad   : > { %p4435_p5 = scmp.ne.s32.totalorder %s4762_s1, %s4434_s10  ;;  %s4439_s23 = sshll.u32 %s4542_s3, 4  ;;  %s4440_s23 = int_to_ptr.vmem [resolvable:$false] %s4439_s23 }
  0xae   : > { %s4441_s17 = scalar_lea.vmem %s4440_s23, 256  ;;  %p4442_p4 = scmp.lt.s32.totalorder %s4762_s1, %s4440_s23 }
  0xaf   : > { %p4437_p6 = pnand %p4435_p5, %p4727_p3  ;;  %p4443_p7 = scmp.lt.s32.totalorder %s4441_s17, %s4434_s10 }
  0xb1   : > { %p4438_p1 = pneg %p4437_p6  ;;  %p4444_p8 = por %p4443_p7, %p4442_p4 }
  0xb3   : > { %p4445_p11 = pnand %p4444_p8, %p4438_p1 }
  0xb5   : > { %4448 = shalt.err (!%p4445_p11)
}
  0xb6   : > { %3947 = dma.hbm_to_vmem [thread:$0]  (!%p4704_p2), %s4758_s11, 128, %s4762_s1, %s4721_s15, %s5280_s18, %s5280_s18, %s5279_s26  }
  0xb7   : > { %p5285_p3 = scmp.ne.s32.totalorder %s5264_s20, 0 }
  0xb8   : > { %s4839_s12 = sand.u32 (!%p5285_p3), 1, %s4521_s14   ;;  %p5286_p12 = scmp.ne.s32.totalorder (!%p5285_p3), %s5273_s22, 0 }
  0xb9   : > { %429 = sbr.rel (%p5285_p3) target bundleno = 4926 (0x133e), region = 60  ;;  %s432_s13 = scalar_lea.sflag (!%p5285_p3), [#allocation3], %s4839_s12 }
  0xba   : > { %s434_s30 = scalar_lea.vmem (!%p5285_p3), [#allocation2], %s4839_s12 }
  0xbe   : > { %4492 = dma.done.wait (%p5286_p12), %s432_s13, 16  }
  0xbf   : > { %4494 = vsyncadd (%p5286_p12), %s432_s13, 4294967280  ;;  %s439_s1 = sand.u32 1, %s4626_s19   ;;  %s4849_s15 = sshll.u32 %s4839_s12, 3 }
  0xc0   : > { %s440_s20 = scalar_lea.sflag [#allocation6], %s439_s1  ;;  %s443_s21 = scalar_lea.vmem [#allocation5], %s4849_s15 }
  0xc1   : > { %4496 = dma.done.wait (%p5286_p12), %s440_s20, 256  }
  0xc2   : > { %4498 = vsyncadd (%p5286_p12), %s440_s20, 4294967040  ;;  %s452_s26 = scalar_lea.vmem [#allocation7], %s4849_s15  ;;  %p5287_p2 = scmp.eq.s32.totalorder %s4626_s19, 0 }
  0xc4   : > { %4500 = dma.done.wait (%p5287_p2), [#allocation9], 16384   ;;  %p5288_p13 = pmov %p5287_p2 }
  0xc5   : > { %p5289_p9 = pmov %p5287_p2 }
  0xc6   : > { %4502 = vsyncadd (%p5288_p13), [#allocation9], 4294950912 }
  0xc7   : > { %4504 = dma.done.wait (%p5289_p9), [#allocation12], 4160   ;;  %p5290_p10 = pmov %p5287_p2 }
  0xc8   : > { %p5291_p0 = pmov %p5287_p2 }
  0xc9   : > { %4506 = vsyncadd (%p5290_p10), [#allocation12], 4294963136 }
  0xca   : > { %4508 = dma.done.wait (%p5291_p0), [#allocation15], 32   ;;  %p5292_p5 = pmov %p5291_p0 }
  0xcb   : > { %v4543_v0 = vmov 0.0   ;;  %vm4544_vm0 = vmmov 0   ;;  %v4011_v1 = vld [vmem:[#allocation8 + $0x38] sm:$0xff]   ;;  %v4013_v3 = vld [vmem:[#allocation8 + $0x30] sm:$0xff]   ;;  %v4015_v5 = vld [vmem:[#allocation8 + $0x28] sm:$0xff]   ;;  %v522_v38 = vlaneseq  ;;  %vm926_vm2 = vcmask 130048  }
  0xcc   : > { %4510 = vsyncadd (%p5292_p5), [#allocation15], 4294967264  ;;  %3618 = vmatprep.subr.bf16.mxu0 %v4543_v0  ;;  %3638 = vmatprep.subr.bf16.mxu1 %v4543_v0  ;;  %v4012_v2 = vld [vmem:[#allocation8 + $0x78] sm:$0xff]   ;;  %v4014_v4 = vld [vmem:[#allocation8 + $0x70] sm:$0xff]   ;;  %v4545_v42 = vmov -1e+09  }
  0xcd   : > { %3634 = vmatprep.mubr.msk.bf16.mxu0 %vm4544_vm0, %v4543_v0  ;;  %3654 = vmatprep.mubr.msk.bf16.mxu1 %vm4544_vm0, %v4543_v0  ;;  %v4016_v6 = vld [vmem:[#allocation8 + $0x68] sm:$0xff]   ;;  %v4017_v7 = vld [vmem:[#allocation8 + $0x20] sm:$0xff]   ;;  %v4019_v9 = vld [vmem:[#allocation8 + $0x18] sm:$0xff]   ;;  %v4915_v40 = vshrl.u32 %v522_v38, 7  ;;  %s5293_s11 = sld [smem:[#allocation32_spill]]  ;;  %s3448_s25 = sshll.u32 %s4626_s19, 7 }
  0xce   : > { %3619 = vmatpush3.bf16.msra.mxu0 %v4011_v1  ;;  %3639 = vmatpush3.bf16.msra.mxu1 %v4012_v2  ;;  %v4018_v8 = vld [vmem:[#allocation8 + $0x60] sm:$0xff]   ;;  %v4020_v10 = vld [vmem:[#allocation8 + $0x58] sm:$0xff]   ;;  %v4021_v11 = vld [vmem:[#allocation8 + $0x10] sm:$0xff]   ;;  %s5294_s27 = sld [smem:[#allocation33_spill]]  ;;  %s517_s24 = scalar_lea.vmem [#allocation16], %s4849_s15 }
  0xcf   : > { %3620 = vmatprep.subr.bf16.mxu0 %v4543_v0  ;;  %3640 = vmatprep.subr.bf16.mxu1 %v4543_v0  ;;  %v4022_v12 = vld [vmem:[#allocation8 + $0x50] sm:$0xff]   ;;  %v4023_v13 = vld [vmem:[#allocation8 + $0x8] sm:$0xff]   ;;  %v4025_v15 = vld [vmem:[#allocation8] sm:$0xff]   ;;  %v4918_v41 = vsub.s32 0, %v4915_v40  ;;  %s3075_s9 = sshll.u32 %s517_s24, 4  ;;  %s5296_s29 = sld [smem:[#allocation34_spill]]  ;;  %s5178_s9 = int_to_ptr.vmem [resolvable:$true] %s3075_s9 }
  0xd0   : > { %v4024_v14 = vld [vmem:[#allocation8 + $0x48] sm:$0xff]   ;;  %v4026_v17 = vld [vmem:[#allocation8 + $0x40] sm:$0xff]   ;;  %v4028_v30 = vld [vmem:[#allocation8 + $0xb8] sm:$0xff]   ;;  %s3062_s10 = scalar_lea.sflag [#allocation4], %s4839_s12  ;;  %s4449_s3 = scalar_lea.vmem %s5178_s9, 128 }
  0xd1   : > { %v4889_v16 = vld [vmem:[%s443_s21] sm:$0xff]   ;;  %v4029_v31 = vld [vmem:[#allocation8 + $0xb0] sm:$0xff]   ;;  %v4032_v34 = vld [vmem:[#allocation8 + $0x98] sm:$0xff]   ;;  %p4450_p6 = scmp.ne.s32.totalorder %s5178_s9, %s4449_s3  ;;  %s4547_s19 = smov [#allocation16]  }
  0xd2   : > { %3621 = vmatpush3.bf16.msra.mxu0 %v4013_v3  ;;  %3641 = vmatpush3.bf16.msra.mxu1 %v4014_v4  ;;  %v4030_v32 = vld [vmem:[#allocation8 + $0xa8] sm:$0xff]   ;;  %v4031_v33 = vld [vmem:[#allocation8 + $0xa0] sm:$0xff]   ;;  %v4033_v35 = vld [vmem:[#allocation8 + $0x90] sm:$0xff]   ;;  %s4453_s15 = sshll.u32 %s4547_s19, 4  ;;  %s4454_s15 = int_to_ptr.vmem [resolvable:$false] %s4453_s15 }
  0xd3   : > { %3622 = vmatprep.subr.bf16.mxu0 %v4543_v0  ;;  %3642 = vmatprep.subr.bf16.mxu1 %v4543_v0  ;;  %v4034_v36 = vld [vmem:[#allocation8 + $0x88] sm:$0xff]   ;;  %v4035_v37 = vld [vmem:[#allocation8 + $0x80] sm:$0xff]   ;;  %s4455_s23 = scalar_lea.vmem %s4454_s15, 256  ;;  %p4456_p8 = scmp.lt.s32.totalorder %s5178_s9, %s4454_s15 }
  0xd4   : > { %v519_v39 = vld [vmem:[%s434_s30] sm:$0x1]  ;;  %p4457_p11 = scmp.lt.s32.totalorder %s4455_s23, %s4449_s3 }
  0xd5   : > { %vm520_vm1 = vcmp.ne.s32.totalorder %v519_v39, 0  ;;  %v4047_v39 = vld [vmem:[#allocation10 + $0x60] ss:$8 sps:$4 sm:$0xff]   ;;  %s5176_s8 = scalar_lea.hbm %s5296_s29, %s3448_s25 }
  0xd6   : > { %3623 = vmatpush3.bf16.msra.mxu0 %v4015_v5  ;;  %3643 = vmatpush3.bf16.msra.mxu1 %v4016_v6  ;;  %v521_v43 = vsel %vm520_vm1, 0.0, %v4545_v42  ;;  %p4458_p3 = por %p4457_p11, %p4456_p8 }
  0xd7   : > { %3624 = vmatprep.subr.bf16.mxu0 %v4543_v0  ;;  %3644 = vmatprep.subr.bf16.mxu1 %v4543_v0  ;;  %v4922_v44 = vrot.slane %v521_v43, %v4918_v41  ;;  %v4052_v43 = vld [vmem:[#allocation10 + $0x54] ss:$8 sps:$4 sm:$0xff]  }
  0xda   : > { %3625 = vmatpush3.bf16.msra.mxu0 %v4017_v7  ;;  %3645 = vmatpush3.bf16.msra.mxu1 %v4018_v8 }
  0xdb   : > { %3626 = vmatprep.subr.bf16.mxu0 %v4543_v0  ;;  %3646 = vmatprep.subr.bf16.mxu1 %v4543_v0 }
  0xde   : > { %3627 = vmatpush3.bf16.msra.mxu0 %v4019_v9  ;;  %3647 = vmatpush3.bf16.msra.mxu1 %v4020_v10 }
  0xdf   : > { %3628 = vmatprep.subr.bf16.mxu0 %v4543_v0  ;;  %3648 = vmatprep.subr.bf16.mxu1 %v4543_v0 }
  0xe2   : > { %3629 = vmatpush3.bf16.msra.mxu0 %v4021_v11  ;;  %3649 = vmatpush3.bf16.msra.mxu1 %v4022_v12  ;;  %v4036_v11 = vld [vmem:[#allocation8 + $0xf8] sm:$0xff]  }
  0xe3   : > { %3630 = vmatprep.subr.bf16.mxu0 %v4543_v0  ;;  %3650 = vmatprep.subr.bf16.mxu1 %v4543_v0 }
  0xe6   : > { %3631 = vmatpush3.bf16.msra.mxu0 %v4023_v13  ;;  %3651 = vmatpush3.bf16.msra.mxu1 %v4024_v14  ;;  %v4037_v13 = vld [vmem:[#allocation8 + $0xf0] sm:$0xff]   ;;  %v4038_v14 = vld [vmem:[#allocation8 + $0xe8] sm:$0xff]  }
  0xe7   : > { %3632 = vmatprep.subr.bf16.mxu0 %v4543_v0  ;;  %3652 = vmatprep.subr.bf16.mxu1 %v4543_v0 }
  0xea   : > { %3633 = vmatpush3.bf16.msra.mxu0 %v4025_v15  ;;  %3653 = vmatpush3.bf16.msra.mxu1 %v4026_v17  ;;  %v4039_v15 = vld [vmem:[#allocation8 + $0xe0] sm:$0xff]   ;;  %v4040_v17 = vld [vmem:[#allocation8 + $0xd8] sm:$0xff]  }
  0xeb   : > { %3658 = vmatprep.subr.bf16.mxu0 %v4543_v0  ;;  %3678 = vmatprep.subr.bf16.mxu1 %v4543_v0 }
  0xed   : > { %3635 = vmatmul.mubr.bf16.vlgmr.msra.gmra.mxu0 %v4889_v16  ;;  %3655 = vmatmul.mubr.bf16.vlgmr.msra.gmra.mxu1 %v4889_v16 }
  0xee   : > { %3674 = vmatprep.mubr.msk.bf16.mxu0 %vm4544_vm0, %v4543_v0  ;;  %3680 = vmatprep.mubr.msk.bf16.mxu1 %vm4544_vm0, %v4543_v0 }
  0xef   : > { %3659 = vmatpush3.bf16.msra.mxu0 %v4028_v30 }
  0xf0   : > { %3660 = vmatprep.subr.bf16.mxu0 %v4543_v0 }
  0xf3   : > { %3661 = vmatpush3.bf16.msra.mxu0 %v4029_v31 }
  0xf4   : > { %3662 = vmatprep.subr.bf16.mxu0 %v4543_v0 }
  0xf7   : > { %3663 = vmatpush3.bf16.msra.mxu0 %v4030_v32 }
  0xf8   : > { %3664 = vmatprep.subr.bf16.mxu0 %v4543_v0 }
  0xfb   : > { %3665 = vmatpush3.bf16.msra.mxu0 %v4031_v33 }
  0xfc   : > { %3666 = vmatprep.subr.bf16.mxu0 %v4543_v0 }
  0xff   : > { %3667 = vmatpush3.bf16.msra.mxu0 %v4032_v34 }
 0x100   : > { %3668 = vmatprep.subr.bf16.mxu0 %v4543_v0 }
 0x103   : > { %3669 = vmatpush3.bf16.msra.mxu0 %v4033_v35 }
 0x104   : > { %3670 = vmatprep.subr.bf16.mxu0 %v4543_v0 }
 0x107   : > { %3671 = vmatpush3.bf16.msra.mxu0 %v4034_v36  ;;  %v4046_v36 = vld [vmem:[#allocation10 + $0x74] ss:$8 sps:$4 sm:$0xff]  }
 0x108   : > { %3672 = vmatprep.subr.bf16.mxu0 %v4543_v0 }
 0x10b   : > { %3673 = vmatpush3.bf16.msra.mxu0 %v4035_v37  ;;  %v4044_v37 = vld [vmem:[#allocation10 + $0x70] ss:$8 sps:$4 sm:$0xff]  }
 0x10c   : > { %1270 = vmatprep.subr.bf16.mxu0 %v4046_v36  ;;  %v4082_v36 = vld [vmem:[#allocation13 + $0x40] sm:$0xff]  }
 0x10e   : > { %3675 = vmatmul.mubr.bf16.vlgmr.msra.gmra.mxu0 %v4889_v16 }
 0x10f   : > { %1271 = vmatpush1.bf16.msra.mxu0 %v4044_v37  ;;  %v4083_v37 = vld [vmem:[#allocation13] sm:$0xff]  }
 0x1ad   : > { %v690_v18 = vpop.f32.mrf.mxu0  ;;  %v781_v19 = vpop.f32.mrf.mxu1 }
 0x1ae   : > { %v697_v27 = vmul.f32 0.088388346, %v690_v18  ;;  %v4041_v18 = vld [vmem:[#allocation8 + $0xd0] sm:$0xff]  }
 0x1af   : > { %v3636_v20 = vpop.f32.mrf.mxu0  ;;  %v3656_v21 = vpop.f32.mrf.mxu1 }
 0x1b0   : > { %v4043_v20 = vld [vmem:[#allocation8 + $0xc0] sm:$0xff]  }
 0x1b1   : > { %v693_v22 = vpop.f32.mrf.mxu0  ;;  %v784_v23 = vpop.f32.mrf.mxu1 }
 0x1b2   : > { %v878_v24 = vpack.c.bf16 %v784_v23, %v781_v19  ;;  %v698_v28 = vmul.f32 0.088388346, %v693_v22  ;;  %v4042_v19 = vld [vmem:[#allocation8 + $0xc8] sm:$0xff]  }
 0x1b3   : > { %v3637_v25 = vpop.f32.mrf.mxu0  ;;  %v3657_v26 = vpop.f32.mrf.mxu1 }
 0x1b4   : > { %3679 = vmatpush3.bf16.xpose.msra.mxu1 %v878_v24  ;;  %v877_v29 = vpack.c.bf16 %v698_v28, %v697_v27  ;;  %v533_v26 = vunpack.c.l.bf16 %v4889_v16 }
 0x1b5   : > { %3684 = vmatprep.subr.bf16.mxu1 %v4543_v0 }
 0x1bb   : > { %3681 = vmatmul.mubr.bf16.vlgmr.msra.gmra.mxu1 %v877_v29  ;;  %v534_v29 = vunpack.c.h.bf16 %v4889_v16  ;;  %v4049_v16 = vld [vmem:[#allocation10 + $0x64] ss:$8 sps:$4 sm:$0xff]  }
 0x1bc   : > { %3686 = vmatprep.mubr.msk.bf16.mxu1 %vm4544_vm0, %v4543_v0  ;;  %1272 = vmatprep.subr.bf16.mxu0 %v4049_v16  ;;  %v4084_v16 = vld [vmem:[#allocation8 + $0x138] sm:$0xff]  }
 0x1bd   : > { %1273 = vmatpush1.bf16.msra.mxu0 %v4047_v39  ;;  %v4086_v39 = vld [vmem:[#allocation8 + $0x130] sm:$0xff]  }
 0x1be   : > { %1274 = vmatprep.subr.bf16.mxu0 %v4052_v43  ;;  %v4088_v43 = vld [vmem:[#allocation8 + $0x128] sm:$0xff]  }
 0x1ce   : > { %v870_v63 = vpop.f32.mrf.mxu0 }
 0x1d0   : > { %v3676_v1 = vpop.f32.mrf.mxu0 }
 0x1d1   : > { %v4075_v1 = vld [vmem:[#allocation13 + $0x20] sm:$0xff]  }
 0x1d2   : > { %v873_v2 = vpop.f32.mrf.mxu0 }
 0x1d3   : > { %v950_v3 = vpack.c.bf16 %v873_v2, %v870_v63  ;;  %v4074_v63 = vld [vmem:[#allocation13 + $0x60] sm:$0xff]   ;;  %v4076_v2 = vld [vmem:[#allocation13 + $0x58] sm:$0xff]  }
 0x1d4   : > { %v3677_v4 = vpop.f32.mrf.mxu0 }
 0x1d5   : > { %3685 = vmatpush3.bf16.msra.mxu1 %v950_v3  ;;  %v4077_v3 = vld [vmem:[#allocation13 + $0x18] sm:$0xff]  }
 0x1d6   : > { %3690 = vmatprep.subr.bf16.mxu1 %v4543_v0 }
 0x27b   : > { %v919_v45 = vpop.f32.mrf.mxu1 }
 0x27c   : > { %v920_v46 = vadd.f32 %v919_v45, %v4922_v44  ;;  %v4050_v45 = vld [vmem:[#allocation10 + $0x50] ss:$8 sps:$4 sm:$0xff]  }
 0x27d   : > { %v3682_v47 = vpop.f32.mrf.mxu1  ;;  %1275 = vmatpush1.bf16.msra.mxu0 %v4050_v45  ;;  %v4090_v45 = vld [vmem:[#allocation8 + $0x120] sm:$0xff]  }
 0x27e   : > { %v927_v48 = vsel %vm926_vm2, %v920_v46, -inf  ;;  %v4055_v47 = vld [vmem:[#allocation10 + $0x44] ss:$8 sps:$4 sm:$0xff]  }
 0x27f   : > { %v922_v49 = vpop.f32.mrf.mxu1  ;;  %928 = vmax.xlane.f32.xlu0 %v927_v48  ;;  %v4058_v48 = vld [vmem:[#allocation10 + $0x34] ss:$8 sps:$4 sm:$0xff]   ;;  %1276 = vmatprep.subr.bf16.mxu0 %v4055_v47 }
 0x280   : > { %v923_v50 = vadd.f32 %v922_v49, %v4922_v44  ;;  %v4056_v49 = vld [vmem:[#allocation10 + $0x30] ss:$8 sps:$4 sm:$0xff]  }
 0x281   : > { %v3683_v51 = vpop.f32.mrf.mxu1  ;;  %v4094_v47 = vld [vmem:[#allocation8 + $0x110] sm:$0xff]  }
 0x282   : > { %v930_v52 = vsel %vm926_vm2, %v923_v50, -inf  ;;  %v4546_v51 = vmov 0  }
 0x283   : > { %931 = vmax.xlane.f32.xlu0 %v930_v52  ;;  %1302 = vmatprep.mubr.bf16.mxu0 %v4546_v51  ;;  %v4059_v52 = vld [vmem:[#allocation10 + $0x20] ss:$8 sps:$4 sm:$0xff]  }
 0x308   : > { %v929_v53 = vpop.xlane.xlu0 %928 }
 0x309   : > { %v933_v54 = vsub.f32 %v920_v46, %v929_v53  ;;  %v4053_v46 = vld [vmem:[#allocation10 + $0x40] ss:$8 sps:$4 sm:$0xff]   ;;  %v4064_v53 = vld [vmem:[#allocation10 + $0x14] ss:$8 sps:$4 sm:$0xff]  }
 0x30a   : > { %1277 = vmatpush1.bf16.msra.mxu0 %v4053_v46  ;;  %v4092_v46 = vld [vmem:[#allocation8 + $0x118] sm:$0xff]  }
 0x30b   : > { %v935_v55 = vmul.f32 1.442695, %v933_v54  ;;  %1278 = vmatprep.subr.bf16.mxu0 %v4058_v48  ;;  %v4062_v54 = vld [vmem:[#allocation10 + $0x10] ss:$8 sps:$4 sm:$0xff]   ;;  %v4096_v48 = vld [vmem:[#allocation8 + $0x108] sm:$0xff]  }
 0x30c   : > { %v932_v56 = vpop.xlane.xlu0 %931 }
 0x30d   : > { %4191 = vpow2.f32 %v935_v55  ;;  %v934_v57 = vsub.f32 %v923_v50, %v932_v56  ;;  %v4061_v50 = vld [vmem:[#allocation10 + $0x24] ss:$8 sps:$4 sm:$0xff]   ;;  %v4065_v56 = vld [vmem:[#allocation10] ss:$8 sps:$4 sm:$0xff]  }
 0x30e   : > { %1279 = vmatpush1.bf16.msra.mxu0 %v4056_v49  ;;  %v4067_v55 = vld [vmem:[#allocation10 + $0x4] ss:$8 sps:$4 sm:$0xff]  }
 0x30f   : > { %v937_v58 = vmul.f32 1.442695, %v934_v57  ;;  %1280 = vmatprep.subr.bf16.mxu0 %v4061_v50  ;;  %v4068_v57 = vld [vmem:[#allocation13 + $0x78] sm:$0xff]  }
 0x310   : > { %v4098_v49 = vld [vmem:[#allocation8 + $0x100] sm:$0xff]   ;;  %v4981_v50 = vld [vmem:[%s452_s26] sm:$0xff]   ;;  %s5295_s26 = sld [smem:[#allocation26_spill]] }
 0x311   : > { %4193 = vpow2.f32 %v937_v58  ;;  %v4069_v58 = vld [vmem:[#allocation13 + $0x38] sm:$0xff]  }
 0x312   : > { %1281 = vmatpush1.bf16.msra.mxu0 %v4059_v52  ;;  %v1186_v52 = vsub.s32 1, %v4915_v40 }
 0x313   : > { %1282 = vmatprep.subr.bf16.mxu0 %v4064_v53  ;;  %v1176_v53 = vld [vmem:[#allocation11] ss:$2 sm:$0x3] }
 0x316   : > { %1283 = vmatpush1.bf16.msra.mxu0 %v4062_v54  ;;  %p5297_p1 = scmp.ne.s32.totalorder %s5295_s26, 0 }
 0x317   : > { %1284 = vmatprep.subr.bf16.mxu0 %v4067_v55  ;;  %v1187_v55 = vrot.slane %v1176_v53, %v1186_v52 }
 0x318   : > { %p4451_p4 = pnand %p4450_p6, %p5297_p1 }
 0x31a   : > { %v4192_v59 = vpop.eup %4191  ;;  %1285 = vmatpush1.bf16.msra.mxu0 %v4065_v56  ;;  %v1183_v56 = vrot.slane %v1176_v53, %v4918_v41  ;;  %p4452_p7 = pneg %p4451_p4 }
 0x31b   : > { %v939_v60 = vsel %vm926_vm2, %v4192_v59, 0.0  ;;  %3710 = vmatprep.subr.bf16.mxu0 %v4543_v0 }
 0x31c   : > { %940 = vadd.xlane.f32.xlu1 %v939_v60  ;;  %v4071_v60 = vld [vmem:[#allocation13 + $0x30] sm:$0xff]   ;;  %p4459_p12 = pnand %p4458_p3, %p4452_p7 }
 0x31e   : > { %v4194_v61 = vpop.eup %4193 }
 0x31f   : > { %v942_v62 = vsel %vm926_vm2, %v4194_v61, 0.0 }
 0x320   : > { %943 = vadd.xlane.f32.xlu1 %v942_v62  ;;  %v4073_v62 = vld [vmem:[#allocation13 + $0x28] sm:$0xff]  }
 0x3a5   : > { %v941_v5 = vpop.xlane.xlu1 %940 }
 0x3a6   : > { %4195 = vrcp.f32 %v941_v5 }
 0x3a9   : > { %v944_v6 = vpop.xlane.xlu1 %943 }
 0x3aa   : > { %4197 = vrcp.f32 %v944_v6 }
 0x3b3   : > { %v4196_v7 = vpop.eup %4195 }
 0x3b4   : > { %v947_v9 = vmul.f32 %v4196_v7, %v4192_v59  ;;  %v4070_v59 = vld [vmem:[#allocation13 + $0x70] sm:$0xff]  }
 0x3b7   : > { %v4198_v8 = vpop.eup %4197 }
 0x3b8   : > { %v948_v10 = vmul.f32 %v4198_v8, %v4194_v61  ;;  %v4072_v61 = vld [vmem:[#allocation13 + $0x68] sm:$0xff]  }
 0x3ba   : > { %v949_v12 = vpack.c.bf16 %v948_v10, %v947_v9 }
 0x3bc   : > { %3687 = vmatmul.mubr.msk.bf16.vlgmr.msra.gmra.mxu1 %vm926_vm2, %v949_v12 }
 0x3bd   : > { %3691 = vmatpush3.bf16.msra.mxu1 %v4036_v11  ;;  %3706 = vmatprep.mubr.msk.bf16.mxu1 %vm4544_vm0, %v4543_v0 }
 0x3be   : > { %3692 = vmatprep.subr.bf16.mxu1 %v4543_v0 }
 0x3c1   : > { %3693 = vmatpush3.bf16.msra.mxu1 %v4037_v13 }
 0x3c2   : > { %3694 = vmatprep.subr.bf16.mxu1 %v4543_v0 }
 0x3c5   : > { %3695 = vmatpush3.bf16.msra.mxu1 %v4038_v14 }
 0x3c6   : > { %3696 = vmatprep.subr.bf16.mxu1 %v4543_v0 }
 0x3c9   : > { %3697 = vmatpush3.bf16.msra.mxu1 %v4039_v15 }
 0x3ca   : > { %3698 = vmatprep.subr.bf16.mxu1 %v4543_v0 }
 0x3cd   : > { %3699 = vmatpush3.bf16.msra.mxu1 %v4040_v17 }
 0x3ce   : > { %3700 = vmatprep.subr.bf16.mxu1 %v4543_v0 }
 0x3d1   : > { %3701 = vmatpush3.bf16.msra.mxu1 %v4041_v18 }
 0x3d2   : > { %3702 = vmatprep.subr.bf16.mxu1 %v4543_v0 }
 0x3d5   : > { %3703 = vmatpush3.bf16.msra.mxu1 %v4042_v19 }
 0x3d6   : > { %3704 = vmatprep.subr.bf16.mxu1 %v4543_v0 }
 0x3d9   : > { %3705 = vmatpush3.bf16.msra.mxu1 %v4043_v20 }
 0x3da   : > { %3494 = vmatprep.subr.bf16.mxu1 %v4068_v57 }
 0x47c   : > { %v988_v21 = vpop.f32.mrf.mxu1 }
 0x47e   : > { %v3688_v22 = vpop.f32.mrf.mxu1 }
 0x47f   : > { %v3294_v22 = vld [vmem:[%s5293_s11] ss:$0 sm:$0xff] }
 0x480   : > { %v991_v23 = vpop.f32.mrf.mxu1 }
 0x481   : > { %v995_v24 = vpack.c.bf16 %v991_v23, %v988_v21 }
 0x482   : > { %v3689_v25 = vpop.f32.mrf.mxu1 }
 0x483   : > { %3707 = vmatmul.mubr.bf16.vlgmr.msra.gmra.mxu1 %v995_v24 }
 0x484   : > { %3495 = vmatpush3.bf16.msra.mxu1 %v4069_v58 }
 0x485   : > { %3496 = vmatprep.subr.bf16.mxu1 %v4070_v59 }
 0x488   : > { %3497 = vmatpush3.bf16.msra.mxu1 %v4071_v60 }
 0x489   : > { %3498 = vmatprep.subr.bf16.mxu1 %v4072_v61 }
 0x48c   : > { %3499 = vmatpush3.bf16.msra.mxu1 %v4073_v62 }
 0x48d   : > { %3500 = vmatprep.subr.bf16.mxu1 %v4074_v63 }
 0x490   : > { %3501 = vmatpush3.bf16.msra.mxu1 %v4075_v1 }
 0x491   : > { %3502 = vmatprep.subr.bf16.mxu1 %v4076_v2 }
 0x494   : > { %3503 = vmatpush3.bf16.msra.mxu1 %v4077_v3 }
 0x543   : > { %v1078_v27 = vpop.f32.mrf.mxu1 }
 0x544   : > { %v4942_v28 = vadd.f32 %v1078_v27, %v533_v26  ;;  %v3295_v27 = vld [vmem:[%s5294_s27] ss:$0 sm:$0xff] }
 0x545   : > { %v3708_v30 = vpop.f32.mrf.mxu1 }
 0x546   : > { %1089 = vadd.xlane.f32.xlu0 %v4942_v28  ;;  %v1096_v33 = vmul.f32 %v4942_v28, %v4942_v28 }
 0x547   : > { %v1081_v31 = vpop.f32.mrf.mxu1 }
 0x548   : > { %v4946_v32 = vadd.f32 %v1081_v31, %v534_v29 }
 0x549   : > { %v3709_v34 = vpop.f32.mrf.mxu1 }
 0x54a   : > { %1098 = vadd.xlane.f32.xlu0 %v1096_v33  ;;  %1091 = vadd.xlane.f32.xlu1 %v4946_v32  ;;  %v1097_v35 = vmul.f32 %v4946_v32, %v4946_v32  ;;  %v4079_v33 = vld [vmem:[#allocation13 + $0x10] sm:$0xff]   ;;  %v4080_v34 = vld [vmem:[#allocation13 + $0x48] sm:$0xff]  }
 0x54e   : > { %1100 = vadd.xlane.f32.xlu1 %v1097_v35  ;;  %v4081_v35 = vld [vmem:[#allocation13 + $0x8] sm:$0xff]  }
 0x5cf   : > { %v1090_v4 = vpop.xlane.xlu0 %1089 }
 0x5d0   : > { %v1094_v5 = vmul.f32 0.0078125, %v1090_v4 }
 0x5d2   : > { %v1104_v8 = vmul.f32 %v1094_v5, %v1094_v5  ;;  %v1108_v19 = vsub.f32 %v4942_v28, %v1094_v5 }
 0x5d3   : > { %v1099_v6 = vpop.xlane.xlu0 %1098  ;;  %v1092_v7 = vpop.xlane.xlu1 %1091 }
 0x5d4   : > { %v1102_v9 = vmul.f32 0.0078125, %v1099_v6  ;;  %v1095_v10 = vmul.f32 0.0078125, %v1092_v7  ;;  %v4085_v6 = vld [vmem:[#allocation8 + $0x178] sm:$0xff]  }
 0x5d6   : > { %v1106_v11 = vsub.f32 %v1102_v9, %v1104_v8  ;;  %v1105_v14 = vmul.f32 %v1095_v10, %v1095_v10  ;;  %v1109_v23 = vsub.f32 %v4946_v32, %v1095_v10  ;;  %v4078_v32 = vld [vmem:[#allocation13 + $0x50] sm:$0xff]   ;;  %v4089_v9 = vld [vmem:[#allocation8 + $0x168] sm:$0xff]   ;;  %v4091_v10 = vld [vmem:[#allocation8 + $0x160] sm:$0xff]  }
 0x5d7   : > { %v1101_v12 = vpop.xlane.xlu1 %1100  ;;  %3504 = vmatprep.subr.bf16.mxu1 %v4078_v32  ;;  %v4087_v8 = vld [vmem:[#allocation8 + $0x170] sm:$0xff]  }
 0x5d8   : > { %v1110_v13 = vadd.f32 1e-05, %v1106_v11  ;;  %v1103_v15 = vmul.f32 0.0078125, %v1101_v12  ;;  %3505 = vmatpush3.bf16.msra.mxu1 %v4079_v33  ;;  %v4093_v11 = vld [vmem:[#allocation8 + $0x158] sm:$0xff]   ;;  %v4095_v12 = vld [vmem:[#allocation8 + $0x150] sm:$0xff]  }
 0x5d9   : > { %3506 = vmatprep.subr.bf16.mxu1 %v4080_v34 }
 0x5da   : > { %4199 = vrsqrt.f32 %v1110_v13  ;;  %v1107_v17 = vsub.f32 %v1103_v15, %v1105_v14  ;;  %v4097_v13 = vld [vmem:[#allocation8 + $0x148] sm:$0xff]   ;;  %v4099_v14 = vld [vmem:[#allocation8 + $0x140] sm:$0xff]  }
 0x5dc   : > { %v1111_v18 = vadd.f32 1e-05, %v1107_v17  ;;  %3507 = vmatpush3.bf16.msra.mxu1 %v4081_v35 }
 0x5dd   : > { %3508 = vmatprep.subr.bf16.mxu1 %v4082_v36  ;;  %v4101_v36 = vld [vmem:[#allocation8 + $0x1b8] sm:$0xff]  }
 0x5de   : > { %4201 = vrsqrt.f32 %v1111_v18 }
 0x5e0   : > { %3509 = vmatpush3.bf16.msra.mxu1 %v4083_v37  ;;  %v4102_v37 = vld [vmem:[#allocation8 + $0x1b0] sm:$0xff]  }
 0x5e1   : > { %3730 = vmatprep.subr.bf16.mxu1 %v4543_v0 }
 0x5e7   : > { %v4200_v20 = vpop.eup %4199 }
 0x5e8   : > { %v1114_v21 = vmul.f32 %v4200_v20, %v1108_v19 }
 0x5ea   : > { %v1120_v26 = vmul.f32 %v3294_v22, %v1114_v21 }
 0x5eb   : > { %v4202_v24 = vpop.eup %4201 }
 0x5ec   : > { %v1115_v25 = vmul.f32 %v4202_v24, %v1109_v23  ;;  %v4963_v30 = vadd.f32 %v3295_v27, %v1120_v26 }
 0x5ee   : > { %v1121_v29 = vmul.f32 %v3294_v22, %v1115_v25 }
 0x5f0   : > { %v4965_v31 = vadd.f32 %v3295_v27, %v1121_v29 }
 0x5f2   : > { %v1178_v28 = vpack.c.bf16 %v4965_v31, %v4963_v30 }
 0x5f4   : > { %1303 = vmatmul.mubr.bf16.vlgmr.msra.gmra.mxu0 %v1178_v28 }
 0x5f5   : > { %3726 = vmatprep.mubr.msk.bf16.mxu0 %vm4544_vm0, %v4543_v0  ;;  %3711 = vmatpush3.bf16.msra.mxu0 %v4084_v16  ;;  %v4103_v16 = vld [vmem:[#allocation8 + $0x1a8] sm:$0xff]  }
 0x5f6   : > { %3712 = vmatprep.subr.bf16.mxu0 %v4543_v0 }
 0x5f9   : > { %3713 = vmatpush3.bf16.msra.mxu0 %v4086_v39  ;;  %v4104_v39 = vld [vmem:[#allocation8 + $0x1a0] sm:$0xff]  }
 0x5fa   : > { %3714 = vmatprep.subr.bf16.mxu0 %v4543_v0 }
 0x5fd   : > { %3715 = vmatpush3.bf16.msra.mxu0 %v4088_v43  ;;  %v4105_v43 = vld [vmem:[#allocation8 + $0x198] sm:$0xff]  }
 0x5fe   : > { %3716 = vmatprep.subr.bf16.mxu0 %v4543_v0 }
 0x601   : > { %3717 = vmatpush3.bf16.msra.mxu0 %v4090_v45  ;;  %v4106_v45 = vld [vmem:[#allocation8 + $0x190] sm:$0xff]  }
 0x602   : > { %3718 = vmatprep.subr.bf16.mxu0 %v4543_v0 }
 0x605   : > { %3719 = vmatpush3.bf16.msra.mxu0 %v4092_v46  ;;  %v4107_v46 = vld [vmem:[#allocation8 + $0x188] sm:$0xff]  }
 0x606   : > { %3720 = vmatprep.subr.bf16.mxu0 %v4543_v0 }
 0x609   : > { %3721 = vmatpush3.bf16.msra.mxu0 %v4094_v47  ;;  %v4108_v47 = vld [vmem:[#allocation8 + $0x180] sm:$0xff]  }
 0x60a   : > { %3722 = vmatprep.subr.bf16.mxu0 %v4543_v0 }
 0x60d   : > { %3723 = vmatpush3.bf16.msra.mxu0 %v4096_v48  ;;  %v526_v48 = vand.u32 127, %v522_v38 }
 0x60e   : > { %3724 = vmatprep.subr.bf16.mxu0 %v4543_v0 }
 0x60f   : > { %vm527_vm3 = vcmp.ge.s32.totalorder %v4915_v40, %v526_v48 }
 0x610   : > { %v529_v53 = vsel %vm527_vm3, 0.0, %v4545_v42 }
 0x611   : > { %3725 = vmatpush3.bf16.msra.mxu0 %v4098_v49  ;;  %v524_v49 = vadd.s32 8, %v4915_v40  ;;  %v3418_v40 = vld [vmem:[#allocation14 + $0x1] ss:$0 sm:$0xff] }
 0x612   : > { %3750 = vmatprep.subr.bf16.mxu0 %v4543_v0 }
 0x613   : > { %vm528_vm4 = vcmp.ge.s32.totalorder %v524_v49, %v526_v48 }
 0x614   : > { %3727 = vmatmul.mubr.bf16.vlgmr.msra.gmra.mxu0 %v4981_v50 }
 0x615   : > { %3766 = vmatprep.mubr.msk.bf16.mxu0 %vm4544_vm0, %v4543_v0  ;;  %3751 = vmatpush3.bf16.msra.mxu0 %v4101_v36 }
 0x616   : > { %3752 = vmatprep.subr.bf16.mxu0 %v4543_v0 }
 0x619   : > { %3753 = vmatpush3.bf16.msra.mxu0 %v4102_v37 }
 0x61a   : > { %3754 = vmatprep.subr.bf16.mxu0 %v4543_v0 }
 0x61d   : > { %3755 = vmatpush3.bf16.msra.mxu0 %v4103_v16 }
 0x61e   : > { %3756 = vmatprep.subr.bf16.mxu0 %v4543_v0 }
 0x621   : > { %3757 = vmatpush3.bf16.msra.mxu0 %v4104_v39 }
 0x622   : > { %3758 = vmatprep.subr.bf16.mxu0 %v4543_v0 }
 0x625   : > { %3759 = vmatpush3.bf16.msra.mxu0 %v4105_v43 }
 0x626   : > { %3760 = vmatprep.subr.bf16.mxu0 %v4543_v0 }
 0x629   : > { %3761 = vmatpush3.bf16.msra.mxu0 %v4106_v45 }
 0x62a   : > { %3762 = vmatprep.subr.bf16.mxu0 %v4543_v0 }
 0x62d   : > { %3763 = vmatpush3.bf16.msra.mxu0 %v4107_v46 }
 0x62e   : > { %3764 = vmatprep.subr.bf16.mxu0 %v4543_v0 }
 0x631   : > { %3765 = vmatpush3.bf16.msra.mxu0 %v4108_v47 }
 0x632   : > { %3782 = vmatprep.subr.bf16.mxu0 %v4543_v0 }
 0x634   : > { %3767 = vmatmul.mubr.bf16.vlgmr.msra.gmra.mxu0 %v4981_v50 }
 0x635   : > { %3798 = vmatprep.mubr.msk.bf16.mxu0 %vm4544_vm0, %v4543_v0 }
 0x6b4   : > { %v1304_v54 = vpop.f32.mrf.mxu0 }
 0x6b5   : > { %v1305_v61 = vadd.f32 %v1304_v54, %v1183_v56 }
 0x6b6   : > { %v1306_v57 = vpop.f32.mrf.mxu0 }
 0x6b7   : > { %v1307_v59 = vadd.f32 %v1306_v57, %v1187_v55  ;;  %v1313_v4 = vmax.f32 %v1305_v61, 0.0  ;;  %v530_v57 = vsel %vm528_vm4, 0.0, %v4545_v42 }
 0x6b8   : > { %v1308_v58 = vpop.f32.mrf.mxu0 }
 0x6b9   : > { %v1309_v60 = vadd.f32 %v1308_v58, %v1183_v56  ;;  %v1314_v2 = vmax.f32 %v1307_v59, 0.0 }
 0x6ba   : > { %v1310_v62 = vpop.f32.mrf.mxu0 }
 0x6bb   : > { %v1311_v63 = vadd.f32 %v1310_v62, %v1187_v55  ;;  %v1315_v1 = vmax.f32 %v1309_v60, 0.0 }
 0x6bd   : > { %v1316_v3 = vmax.f32 %v1311_v63, 0.0  ;;  %v1317_v7 = vpack.c.bf16 %v1315_v1, %v1313_v4 }
 0x6bf   : > { %v1318_v5 = vpack.c.bf16 %v1316_v3, %v1314_v2 }
 0x6c1   : > { %1451 = vmatprep.mubr.bf16.mxu1 %v1318_v5  ;;  %v3312_v5 = vld [vmem:[#allocation14] ss:$0 sm:$0xff] }
 0x6c2   : > { %1452 = vmatmul.mubr.bf16.vlgmr.msra.gmra.mxu1 %v1317_v7 }
 0x6c3   : > { %3731 = vmatpush3.bf16.msra.mxu1 %v4085_v6  ;;  %3746 = vmatprep.mubr.msk.bf16.mxu1 %vm4544_vm0, %v4543_v0 }
 0x6c4   : > { %3732 = vmatprep.subr.bf16.mxu1 %v4543_v0 }
 0x6c7   : > { %3733 = vmatpush3.bf16.msra.mxu1 %v4087_v8 }
 0x6c8   : > { %3734 = vmatprep.subr.bf16.mxu1 %v4543_v0 }
 0x6cb   : > { %3735 = vmatpush3.bf16.msra.mxu1 %v4089_v9 }
 0x6cc   : > { %3736 = vmatprep.subr.bf16.mxu1 %v4543_v0 }
 0x6cf   : > { %3737 = vmatpush3.bf16.msra.mxu1 %v4091_v10 }
 0x6d0   : > { %3738 = vmatprep.subr.bf16.mxu1 %v4543_v0 }
 0x6d3   : > { %3739 = vmatpush3.bf16.msra.mxu1 %v4093_v11 }
 0x6d4   : > { %3740 = vmatprep.subr.bf16.mxu1 %v4543_v0  ;;  %v1662_v15 = vpop.f32.mrf.mxu0 }
 0x6d5   : > { %v1669_v18 = vmul.f32 0.088388346, %v1662_v15 }
 0x6d6   : > { %v3728_v17 = vpop.f32.mrf.mxu0 }
 0x6d7   : > { %3741 = vmatpush3.bf16.msra.mxu1 %v4095_v12 }
 0x6d8   : > { %3742 = vmatprep.subr.bf16.mxu1 %v4543_v0  ;;  %v1665_v19 = vpop.f32.mrf.mxu0 }
 0x6d9   : > { %v1670_v20 = vmul.f32 0.088388346, %v1665_v19 }
 0x6da   : > { %v3729_v21 = vpop.f32.mrf.mxu0 }
 0x6db   : > { %3743 = vmatpush3.bf16.msra.mxu1 %v4097_v13  ;;  %v1849_v22 = vpack.c.bf16 %v1670_v20, %v1669_v18  ;;  %v4110_v20 = vld [vmem:[#allocation8 + $0x1f0] sm:$0xff]   ;;  %v4111_v21 = vld [vmem:[#allocation8 + $0x1e8] sm:$0xff]  }
 0x6dc   : > { %3744 = vmatprep.subr.bf16.mxu1 %v4543_v0 }
 0x6df   : > { %3745 = vmatpush3.bf16.msra.mxu1 %v4099_v14 }
 0x6e0   : > { %3770 = vmatprep.subr.bf16.mxu1 %v4543_v0 }
 0x6e2   : > { %3747 = vmatmul.mubr.bf16.vlgmr.msra.gmra.mxu1 %v4981_v50 }
 0x6e3   : > { %3772 = vmatprep.mubr.msk.bf16.mxu1 %vm4544_vm0, %v4543_v0 }
 0x6f4   : > { %v1842_v15 = vpop.f32.mrf.mxu0 }
 0x782   : > { %v3510_v23 = vpop.f32.mrf.mxu1 }
 0x784   : > { %v3511_v24 = vpop.f32.mrf.mxu1 }
 0x785   : > { %v5004_v25 = vadd.f32 %v3511_v24, %v3510_v23  ;;  %v4113_v23 = vld [vmem:[#allocation8 + $0x1d8] sm:$0xff]   ;;  %v4114_v24 = vld [vmem:[#allocation8 + $0x1d0] sm:$0xff]  }
 0x786   : > { %v3513_v26 = vpop.f32.mrf.mxu1 }
 0x787   : > { %v1454_v42 = vadd.f32 %v5004_v25, %v3312_v5  ;;  %v4115_v25 = vld [vmem:[#allocation8 + $0x1c8] sm:$0xff]  }
 0x788   : > { %v3514_v27 = vpop.f32.mrf.mxu1 }
 0x789   : > { %v5006_v29 = vadd.f32 %v3514_v27, %v3513_v26  ;;  %v5033_v10 = vadd.f32 %v1454_v42, %v4963_v30  ;;  %v3768_v30 = vpop.f32.mrf.mxu0 }
 0x78b   : > { %v1457_v9 = vadd.f32 %v5006_v29, %v3312_v5  ;;  %v1470_v13 = vmul.f32 %v5033_v10, %v5033_v10  ;;  %v1845_v17 = vpop.f32.mrf.mxu0 }
 0x78c   : > { %v1915_v18 = vpack.c.bf16 %v1845_v17, %v1842_v15 }
 0x78d   : > { %v5038_v12 = vadd.f32 %v1457_v9, %v4965_v31  ;;  %v3769_v19 = vpop.f32.mrf.mxu0  ;;  %v4109_v31 = vld [vmem:[#allocation8 + $0x1f8] sm:$0xff]   ;;  %v4123_v9 = vld [vmem:[#allocation8 + $0x248] sm:$0xff]  }
 0x78e   : > { %3783 = vmatpush3.bf16.msra.mxu0 %v4109_v31 }
 0x78f   : > { %v1471_v14 = vmul.f32 %v5038_v12, %v5038_v12  ;;  %3784 = vmatprep.subr.bf16.mxu0 %v4543_v0 }
 0x792   : > { %3785 = vmatpush3.bf16.msra.mxu0 %v4110_v20  ;;  %v1505_v20 = vunpack.c.h.bf16 %v4981_v50 }
 0x793   : > { %3786 = vmatprep.subr.bf16.mxu0 %v4543_v0 }
 0x796   : > { %3787 = vmatpush3.bf16.msra.mxu0 %v4111_v21 }
 0x797   : > { %3788 = vmatprep.subr.bf16.mxu0 %v4543_v0 }
 0x7a2   : > { %v1753_v28 = vpop.f32.mrf.mxu1 }
 0x7a4   : > { %v3748_v32 = vpop.f32.mrf.mxu1 }
 0x7a6   : > { %v1756_v33 = vpop.f32.mrf.mxu1 }
 0x7a7   : > { %v1850_v34 = vpack.c.bf16 %v1756_v33, %v1753_v28 }
 0x7a8   : > { %v3749_v35 = vpop.f32.mrf.mxu1 }
 0x7a9   : > { %3771 = vmatpush3.bf16.xpose.msra.mxu1 %v1850_v34  ;;  %v4116_v35 = vld [vmem:[#allocation8 + $0x1c0] sm:$0xff]  }
 0x7aa   : > { %3776 = vmatprep.subr.bf16.mxu1 %v4543_v0 }
 0x7b0   : > { %3773 = vmatmul.mubr.bf16.vlgmr.msra.gmra.mxu1 %v1849_v22  ;;  %v4112_v22 = vld [vmem:[#allocation8 + $0x1e0] sm:$0xff]  }
 0x7b1   : > { %3778 = vmatprep.mubr.msk.bf16.mxu1 %vm4544_vm0, %v4543_v0  ;;  %3777 = vmatpush3.bf16.msra.mxu1 %v1915_v18  ;;  %v1504_v18 = vunpack.c.l.bf16 %v4981_v50  ;;  %v4128_v50 = vld [vmem:[#allocation8 + $0x220] sm:$0xff]  }
 0x7b2   : > { %3802 = vmatprep.subr.bf16.mxu1 %v4543_v0  ;;  %3789 = vmatpush3.bf16.msra.mxu0 %v4112_v22 }
 0x7b3   : > { %3790 = vmatprep.subr.bf16.mxu0 %v4543_v0 }
 0x7b6   : > { %3791 = vmatpush3.bf16.msra.mxu0 %v4113_v23 }
 0x7b7   : > { %3792 = vmatprep.subr.bf16.mxu0 %v4543_v0 }
 0x7ba   : > { %3793 = vmatpush3.bf16.msra.mxu0 %v4114_v24 }
 0x7bb   : > { %3794 = vmatprep.subr.bf16.mxu0 %v4543_v0 }
 0x7be   : > { %3795 = vmatpush3.bf16.msra.mxu0 %v4115_v25 }
 0x7bf   : > { %3796 = vmatprep.subr.bf16.mxu0 %v4543_v0 }
 0x7c2   : > { %3797 = vmatpush3.bf16.msra.mxu0 %v4116_v35  ;;  %v4130_v35 = vld [vmem:[#allocation8 + $0x210] sm:$0xff]  }
 0x7c3   : > { %3822 = vmatprep.subr.bf16.mxu0 %v4543_v0 }
 0x870   : > { %v1885_v54 = vpop.f32.mrf.mxu1 }
 0x871   : > { %v1886_v55 = vadd.f32 %v1885_v54, %v529_v53 }
 0x872   : > { %v3774_v56 = vpop.f32.mrf.mxu1 }
 0x873   : > { %v1892_v58 = vsel %vm926_vm2, %v1886_v55, -inf }
 0x874   : > { %1893 = vmax.xlane.f32.xlu0 %v1892_v58  ;;  %v1888_v59 = vpop.f32.mrf.mxu1  ;;  %v4117_v58 = vld [vmem:[#allocation8 + $0x278] sm:$0xff]  }
 0x875   : > { %v1889_v60 = vadd.f32 %v1888_v59, %v530_v57 }
 0x876   : > { %v3775_v61 = vpop.f32.mrf.mxu1 }
 0x877   : > { %v1895_v38 = vsel %vm926_vm2, %v1889_v60, -inf }
 0x878   : > { %1896 = vmax.xlane.f32.xlu1 %v1895_v38 }
 0x8fd   : > { %v1894_v62 = vpop.xlane.xlu0 %1893 }
 0x8fe   : > { %v1898_v63 = vsub.f32 %v1886_v55, %v1894_v62  ;;  %v4118_v62 = vld [vmem:[#allocation8 + $0x270] sm:$0xff]  }
 0x900   : > { %v1900_v1 = vmul.f32 1.442695, %v1898_v63  ;;  %v4119_v63 = vld [vmem:[#allocation8 + $0x268] sm:$0xff]  }
 0x901   : > { %v1897_v2 = vpop.xlane.xlu1 %1896 }
 0x902   : > { %4203 = vpow2.f32 %v1900_v1  ;;  %v1899_v3 = vsub.f32 %v1889_v60, %v1897_v2  ;;  %v4120_v1 = vld [vmem:[#allocation8 + $0x260] sm:$0xff]   ;;  %v4121_v2 = vld [vmem:[#allocation8 + $0x258] sm:$0xff]  }
 0x904   : > { %v1902_v4 = vmul.f32 1.442695, %v1899_v3 }
 0x906   : > { %4205 = vpow2.f32 %v1902_v4 }
 0x90f   : > { %v4204_v6 = vpop.eup %4203 }
 0x910   : > { %v1904_v7 = vsel %vm926_vm2, %v4204_v6, 0.0 }
 0x911   : > { %1905 = vadd.xlane.f32.xlu0 %v1904_v7 }
 0x913   : > { %v4206_v8 = vpop.eup %4205 }
 0x914   : > { %v1907_v11 = vsel %vm926_vm2, %v4206_v8, 0.0 }
 0x915   : > { %1908 = vadd.xlane.f32.xlu1 %v1907_v11  ;;  %1464 = vadd.xlane.f32.xlu0 %v5033_v10  ;;  %v3329_v11 = vld [vmem:[%s5293_s11 + $0x1] ss:$0 sm:$0xff] }
 0x919   : > { %1466 = vadd.xlane.f32.xlu1 %v5038_v12  ;;  %1472 = vadd.xlane.f32.xlu0 %v1470_v13 }
 0x91d   : > { %1474 = vadd.xlane.f32.xlu1 %v1471_v14 }
 0x99a   : > { %v1906_v26 = vpop.xlane.xlu0 %1905 }
 0x99b   : > { %4207 = vrcp.f32 %v1906_v26 }
 0x99e   : > { %v1909_v27 = vpop.xlane.xlu1 %1908  ;;  %v1465_v37 = vpop.xlane.xlu0 %1464 }
 0x99f   : > { %4209 = vrcp.f32 %v1909_v27  ;;  %v1468_v45 = vmul.f32 0.0078125, %v1465_v37  ;;  %v4125_v27 = vld [vmem:[#allocation8 + $0x238] sm:$0xff]  }
 0x9a1   : > { %v1478_v53 = vmul.f32 %v1468_v45, %v1468_v45  ;;  %v1482_v42 = vsub.f32 %v5033_v10, %v1468_v45  ;;  %v3330_v10 = vld [vmem:[%s5294_s27 + $0x1] ss:$0 sm:$0xff] }
 0x9a2   : > { %v1467_v36 = vpop.xlane.xlu1 %1466  ;;  %v1473_v43 = vpop.xlane.xlu0 %1472 }
 0x9a3   : > { %v1469_v39 = vmul.f32 0.0078125, %v1467_v36  ;;  %v1476_v48 = vmul.f32 0.0078125, %v1473_v43  ;;  %v4132_v43 = vld [vmem:[#allocation8 + $0x200] sm:$0xff]  }
 0x9a5   : > { %v1479_v47 = vmul.f32 %v1469_v39, %v1469_v39  ;;  %v1480_v56 = vsub.f32 %v1476_v48, %v1478_v53  ;;  %v1483_v4 = vsub.f32 %v5038_v12, %v1469_v39  ;;  %v4124_v12 = vld [vmem:[#allocation8 + $0x240] sm:$0xff]   ;;  %v4131_v39 = vld [vmem:[#allocation8 + $0x208] sm:$0xff]  }
 0x9a6   : > { %v1475_v16 = vpop.xlane.xlu1 %1474 }
 0x9a7   : > { %v1477_v46 = vmul.f32 0.0078125, %v1475_v16  ;;  %v1484_v38 = vadd.f32 1e-05, %v1480_v56 }
 0x9a8   : > { %v4208_v29 = vpop.eup %4207 }
 0x9a9   : > { %v1912_v32 = vmul.f32 %v4208_v29, %v4204_v6  ;;  %v1481_v54 = vsub.f32 %v1477_v46, %v1479_v47  ;;  %v4122_v6 = vld [vmem:[#allocation8 + $0x250] sm:$0xff]  }
 0x9aa   : > { %v4126_v29 = vld [vmem:[#allocation8 + $0x230] sm:$0xff]  }
 0x9ab   : > { %v1485_v59 = vadd.f32 1e-05, %v1481_v54 }
 0x9ac   : > { %v4210_v28 = vpop.eup %4209 }
 0x9ad   : > { %v1913_v33 = vmul.f32 %v4210_v28, %v4206_v8  ;;  %4211 = vrsqrt.f32 %v1485_v59  ;;  %v4127_v28 = vld [vmem:[#allocation8 + $0x228] sm:$0xff]  }
 0x9ae   : > { %4213 = vrsqrt.f32 %v1484_v38 }
 0x9af   : > { %v1914_v34 = vpack.c.bf16 %v1913_v33, %v1912_v32  ;;  %v4129_v32 = vld [vmem:[#allocation8 + $0x218] sm:$0xff]  }
 0x9b1   : > { %3779 = vmatmul.mubr.msk.bf16.vlgmr.msra.gmra.mxu1 %vm926_vm2, %v1914_v34 }
 0x9b2   : > { %3818 = vmatprep.mubr.msk.bf16.mxu1 %vm4544_vm0, %v4543_v0  ;;  %3803 = vmatpush3.bf16.msra.mxu1 %v4125_v27 }
 0x9b3   : > { %3804 = vmatprep.subr.bf16.mxu1 %v4543_v0 }
 0x9b6   : > { %3805 = vmatpush3.bf16.msra.mxu1 %v4126_v29 }
 0x9b7   : > { %3806 = vmatprep.subr.bf16.mxu1 %v4543_v0 }
 0x9ba   : > { %v4212_v3 = vpop.eup %4211  ;;  %3807 = vmatpush3.bf16.msra.mxu1 %v4127_v28 }
 0x9bb   : > { %v4214_v5 = vpop.eup %4213  ;;  %v1489_v7 = vmul.f32 %v4212_v3, %v1483_v4  ;;  %3808 = vmatprep.subr.bf16.mxu1 %v4543_v0 }
 0x9bc   : > { %v1488_v8 = vmul.f32 %v4214_v5, %v1482_v42 }
 0x9bd   : > { %v1495_v13 = vmul.f32 %v3329_v11, %v1489_v7 }
 0x9be   : > { %v1494_v14 = vmul.f32 %v3329_v11, %v1488_v8  ;;  %3809 = vmatpush3.bf16.msra.mxu1 %v4128_v50 }
 0x9bf   : > { %v1501_v15 = vadd.f32 %v3330_v10, %v1495_v13  ;;  %3810 = vmatprep.subr.bf16.mxu1 %v4543_v0  ;;  %v4134_v13 = vld [vmem:[#allocation8 + $0x2b0] sm:$0xff]  }
 0x9c0   : > { %v1500_v30 = vadd.f32 %v3330_v10, %v1494_v14  ;;  %v4135_v14 = vld [vmem:[#allocation8 + $0x2a8] sm:$0xff]   ;;  %v4137_v10 = vld [vmem:[#allocation8 + $0x298] sm:$0xff]  }
 0x9c2   : > { %v5074_v17 = vpack.c.bf16 %v1501_v15, %v1500_v30  ;;  %3811 = vmatpush3.bf16.msra.mxu1 %v4129_v32  ;;  %v4138_v15 = vld [vmem:[#allocation8 + $0x290] sm:$0xff]   ;;  %v4139_v30 = vld [vmem:[#allocation8 + $0x288] sm:$0xff]  }
 0x9c3   : > { %3812 = vmatprep.subr.bf16.mxu1 %v4543_v0 }
 0x9c6   : > { %3813 = vmatpush3.bf16.msra.mxu1 %v4130_v35 }
 0x9c7   : > { %3814 = vmatprep.subr.bf16.mxu1 %v4543_v0 }
 0x9ca   : > { %3815 = vmatpush3.bf16.msra.mxu1 %v4131_v39 }
 0x9cb   : > { %3816 = vmatprep.subr.bf16.mxu1 %v4543_v0 }
 0x9ce   : > { %3817 = vmatpush3.bf16.msra.mxu1 %v4132_v43 }
 0x9cf   : > { %3842 = vmatprep.subr.bf16.mxu1 %v4543_v0 }
 0xa71   : > { %v1953_v49 = vpop.f32.mrf.mxu1 }
 0xa73   : > { %v3780_v55 = vpop.f32.mrf.mxu1 }
 0xa75   : > { %v1956_v57 = vpop.f32.mrf.mxu1 }
 0xa76   : > { %v1960_v60 = vpack.c.bf16 %v1956_v57, %v1953_v49 }
 0xa77   : > { %v3781_v61 = vpop.f32.mrf.mxu1 }
 0xa78   : > { %3799 = vmatmul.mubr.bf16.vlgmr.msra.gmra.mxu0 %v1960_v60 }
 0xa79   : > { %3823 = vmatpush3.bf16.msra.mxu0 %v4117_v58  ;;  %3838 = vmatprep.mubr.msk.bf16.mxu0 %vm4544_vm0, %v4543_v0 }
 0xa7a   : > { %3824 = vmatprep.subr.bf16.mxu0 %v4543_v0 }
 0xa7d   : > { %3825 = vmatpush3.bf16.msra.mxu0 %v4118_v62 }
 0xa7e   : > { %3826 = vmatprep.subr.bf16.mxu0 %v4543_v0 }
 0xa81   : > { %3827 = vmatpush3.bf16.msra.mxu0 %v4119_v63 }
 0xa82   : > { %3828 = vmatprep.subr.bf16.mxu0 %v4543_v0 }
 0xa85   : > { %3829 = vmatpush3.bf16.msra.mxu0 %v4120_v1  ;;  %v3365_v1 = vld [vmem:[%s5293_s11 + $0x2] ss:$0 sm:$0xff] }
 0xa86   : > { %3830 = vmatprep.subr.bf16.mxu0 %v4543_v0 }
 0xa89   : > { %3831 = vmatpush3.bf16.msra.mxu0 %v4121_v2 }
 0xa8a   : > { %3832 = vmatprep.subr.bf16.mxu0 %v4543_v0 }
 0xa8d   : > { %3833 = vmatpush3.bf16.msra.mxu0 %v4122_v6  ;;  %v3366_v6 = vld [vmem:[%s5294_s27 + $0x2] ss:$0 sm:$0xff] }
 0xa8e   : > { %3834 = vmatprep.subr.bf16.mxu0 %v4543_v0 }
 0xa91   : > { %3835 = vmatpush3.bf16.msra.mxu0 %v4123_v9  ;;  %v4133_v9 = vld [vmem:[#allocation8 + $0x2b8] sm:$0xff]  }
 0xa92   : > { %3836 = vmatprep.subr.bf16.mxu0 %v4543_v0 }
 0xa95   : > { %3837 = vmatpush3.bf16.msra.mxu0 %v4124_v12  ;;  %v4136_v12 = vld [vmem:[#allocation8 + $0x2a0] sm:$0xff]  }
 0xa96   : > { %3874 = vmatprep.subr.bf16.mxu0 %v4543_v0 }
 0xa98   : > { %3839 = vmatmul.mubr.bf16.vlgmr.msra.gmra.mxu0 %v5074_v17 }
 0xa99   : > { %3890 = vmatprep.mubr.msk.bf16.mxu0 %vm4544_vm0, %v4543_v0 }
 0xb38   : > { %v2043_v19 = vpop.f32.mrf.mxu0 }
 0xb39   : > { %v2050_v31 = vadd.f32 %v2043_v19, %v1504_v18  ;;  %v4140_v18 = vld [vmem:[#allocation8 + $0x280] sm:$0xff]  }
 0xb3a   : > { %v3800_v21 = vpop.f32.mrf.mxu0 }
 0xb3b   : > { %2054 = vadd.xlane.f32.xlu0 %v2050_v31  ;;  %v2060_v24 = vmul.f32 %v2050_v31, %v2050_v31 }
 0xb3c   : > { %v2046_v22 = vpop.f32.mrf.mxu0 }
 0xb3d   : > { %v2051_v23 = vadd.f32 %v2046_v22, %v1505_v20 }
 0xb3e   : > { %v3801_v25 = vpop.f32.mrf.mxu0 }
 0xb3f   : > { %2056 = vadd.xlane.f32.xlu1 %v2051_v23  ;;  %2062 = vadd.xlane.f32.xlu0 %v2060_v24  ;;  %v2061_v26 = vmul.f32 %v2051_v23, %v2051_v23 }
 0xb43   : > { %2064 = vadd.xlane.f32.xlu1 %v2061_v26 }
 0xb58   : > { %v5086_v33 = vpop.f32.mrf.mxu0 }
 0xb5a   : > { %v3840_v34 = vpop.f32.mrf.mxu0 }
 0xb5c   : > { %v5089_v36 = vpop.f32.mrf.mxu0 }
 0xb5d   : > { %v2432_v37 = vpack.c.bf16 %v5089_v36, %v5086_v33 }
 0xb5e   : > { %v3841_v16 = vpop.f32.mrf.mxu0 }
 0xbc4   : > { %v2055_v45 = vpop.xlane.xlu0 %2054 }
 0xbc5   : > { %v2058_v46 = vmul.f32 0.0078125, %v2055_v45 }
 0xbc7   : > { %v2068_v49 = vmul.f32 %v2058_v46, %v2058_v46  ;;  %v2072_v38 = vsub.f32 %v2050_v31, %v2058_v46 }
 0xbc8   : > { %v2057_v47 = vpop.xlane.xlu1 %2056  ;;  %v2063_v48 = vpop.xlane.xlu0 %2062 }
 0xbc9   : > { %v2059_v53 = vmul.f32 0.0078125, %v2057_v47  ;;  %v2066_v54 = vmul.f32 0.0078125, %v2063_v48 }
 0xbcb   : > { %v2070_v55 = vsub.f32 %v2066_v54, %v2068_v49  ;;  %v2069_v57 = vmul.f32 %v2059_v53, %v2059_v53  ;;  %v2073_v2 = vsub.f32 %v2051_v23, %v2059_v53 }
 0xbcc   : > { %v2065_v56 = vpop.xlane.xlu1 %2064 }
 0xbcd   : > { %v2074_v58 = vadd.f32 1e-05, %v2070_v55  ;;  %v2067_v59 = vmul.f32 0.0078125, %v2065_v56  ;;  %v4142_v55 = vld [vmem:[#allocation8 + $0x2f0] sm:$0xff]   ;;  %v4143_v56 = vld [vmem:[#allocation8 + $0x2e8] sm:$0xff]  }
 0xbcf   : > { %4215 = vrsqrt.f32 %v2074_v58  ;;  %v2071_v60 = vsub.f32 %v2067_v59, %v2069_v57  ;;  %v4144_v57 = vld [vmem:[#allocation8 + $0x2e0] sm:$0xff]   ;;  %v4145_v58 = vld [vmem:[#allocation8 + $0x2d8] sm:$0xff]   ;;  %v4146_v59 = vld [vmem:[#allocation8 + $0x2d0] sm:$0xff]  }
 0xbd1   : > { %v2075_v61 = vadd.f32 1e-05, %v2071_v60 }
 0xbd3   : > { %4217 = vrsqrt.f32 %v2075_v61 }
 0xbdc   : > { %v4216_v62 = vpop.eup %4215 }
 0xbdd   : > { %v2078_v63 = vmul.f32 %v4216_v62, %v2072_v38 }
 0xbdf   : > { %v2084_v5 = vmul.f32 %v3365_v1, %v2078_v63 }
 0xbe0   : > { %v4218_v3 = vpop.eup %4217 }
 0xbe1   : > { %v2079_v4 = vmul.f32 %v4218_v3, %v2073_v2  ;;  %v5102_v7 = vadd.f32 %v3366_v6, %v2084_v5  ;;  %v4147_v3 = vld [vmem:[#allocation8 + $0x2c8] sm:$0xff]  }
 0xbe3   : > { %v2085_v42 = vmul.f32 %v3365_v1, %v2079_v4  ;;  %v4148_v4 = vld [vmem:[#allocation8 + $0x2c0] sm:$0xff]  }
 0xbe5   : > { %v5104_v8 = vadd.f32 %v3366_v6, %v2085_v42 }
 0xbe7   : > { %v2160_v11 = vpack.c.bf16 %v5104_v8, %v5102_v7 }
 0xbe9   : > { %3819 = vmatmul.mubr.bf16.vlgmr.msra.gmra.mxu1 %v2160_v11 }
 0xbea   : > { %3843 = vmatpush3.bf16.msra.mxu1 %v4133_v9  ;;  %3858 = vmatprep.mubr.msk.bf16.mxu1 %vm4544_vm0, %v4543_v0 }
 0xbeb   : > { %3844 = vmatprep.subr.bf16.mxu1 %v4543_v0 }
 0xbee   : > { %3845 = vmatpush3.bf16.msra.mxu1 %v4134_v13 }
 0xbef   : > { %3846 = vmatprep.subr.bf16.mxu1 %v4543_v0 }
 0xbf2   : > { %3847 = vmatpush3.bf16.msra.mxu1 %v4135_v14 }
 0xbf3   : > { %3848 = vmatprep.subr.bf16.mxu1 %v4543_v0 }
 0xbf6   : > { %3849 = vmatpush3.bf16.msra.mxu1 %v4136_v12 }
 0xbf7   : > { %3850 = vmatprep.subr.bf16.mxu1 %v4543_v0 }
 0xbfa   : > { %3851 = vmatpush3.bf16.msra.mxu1 %v4137_v10 }
 0xbfb   : > { %3852 = vmatprep.subr.bf16.mxu1 %v4543_v0 }
 0xbfe   : > { %3853 = vmatpush3.bf16.msra.mxu1 %v4138_v15 }
 0xbff   : > { %3854 = vmatprep.subr.bf16.mxu1 %v4543_v0 }
 0xc02   : > { %3855 = vmatpush3.bf16.msra.mxu1 %v4139_v30 }
 0xc03   : > { %3856 = vmatprep.subr.bf16.mxu1 %v4543_v0 }
 0xc06   : > { %3857 = vmatpush3.bf16.msra.mxu1 %v4140_v18  ;;  %v4149_v18 = vld [vmem:[#allocation10 + $0xf0] ss:$8 sps:$4 sm:$0xff]  }
 0xc07   : > { %3862 = vmatprep.subr.bf16.mxu1 %v4543_v0 }
 0xc09   : > { %3859 = vmatmul.mubr.bf16.vlgmr.msra.gmra.mxu1 %v5074_v17 }
 0xc0a   : > { %3863 = vmatpush3.bf16.xpose.msra.mxu1 %v2432_v37  ;;  %3864 = vmatprep.mubr.msk.bf16.mxu1 %vm4544_vm0, %v4543_v0 }
 0xc0b   : > { %3868 = vmatprep.subr.bf16.mxu1 %v4543_v0 }
 0xca9   : > { %v2243_v19 = vpop.f32.mrf.mxu1 }
 0xcaa   : > { %v2250_v21 = vmul.f32 0.088388346, %v2243_v19  ;;  %v4154_v19 = vld [vmem:[#allocation10 + $0xe4] ss:$8 sps:$4 sm:$0xff]  }
 0xcab   : > { %v3820_v31 = vpop.f32.mrf.mxu1 }
 0xcac   : > { %v4152_v31 = vld [vmem:[#allocation10 + $0xe0] ss:$8 sps:$4 sm:$0xff]  }
 0xcad   : > { %v2246_v20 = vpop.f32.mrf.mxu1 }
 0xcae   : > { %v2251_v22 = vmul.f32 0.088388346, %v2246_v20  ;;  %v4155_v20 = vld [vmem:[#allocation10 + $0xd0] ss:$8 sps:$4 sm:$0xff]  }
 0xcaf   : > { %v3821_v23 = vpop.f32.mrf.mxu1 }
 0xcb0   : > { %v2431_v24 = vpack.c.bf16 %v2251_v22, %v2250_v21  ;;  %v4158_v21 = vld [vmem:[#allocation10 + $0xc0] ss:$8 sps:$4 sm:$0xff]   ;;  %v4160_v22 = vld [vmem:[#allocation10 + $0xc4] ss:$8 sps:$4 sm:$0xff]   ;;  %v4163_v23 = vld [vmem:[#allocation10 + $0xb4] ss:$8 sps:$4 sm:$0xff]  }
 0xcb2   : > { %3865 = vmatmul.mubr.bf16.vlgmr.msra.gmra.mxu1 %v2431_v24  ;;  %v4161_v24 = vld [vmem:[#allocation10 + $0xb0] ss:$8 sps:$4 sm:$0xff]  }
 0xcb3   : > { %3870 = vmatprep.mubr.msk.bf16.mxu1 %vm4544_vm0, %v4543_v0 }
 0xcc9   : > { %v2424_v17 = vpop.f32.mrf.mxu1 }
 0xccb   : > { %v3860_v25 = vpop.f32.mrf.mxu1 }
 0xccc   : > { %v4164_v25 = vld [vmem:[#allocation10 + $0xa0] ss:$8 sps:$4 sm:$0xff]  }
 0xccd   : > { %v2427_v26 = vpop.f32.mrf.mxu1 }
 0xcce   : > { %v2497_v27 = vpack.c.bf16 %v2427_v26, %v2424_v17  ;;  %v4166_v17 = vld [vmem:[#allocation10 + $0xa4] ss:$8 sps:$4 sm:$0xff]   ;;  %v4169_v26 = vld [vmem:[#allocation10 + $0x94] ss:$8 sps:$4 sm:$0xff]  }
 0xccf   : > { %v3861_v29 = vpop.f32.mrf.mxu1 }
 0xcd0   : > { %3869 = vmatpush3.bf16.msra.mxu1 %v2497_v27  ;;  %v4167_v27 = vld [vmem:[#allocation10 + $0x90] ss:$8 sps:$4 sm:$0xff]   ;;  %v4172_v29 = vld [vmem:[#allocation10 + $0x84] ss:$8 sps:$4 sm:$0xff]  }
 0xd72   : > { %v2467_v28 = vpop.f32.mrf.mxu1 }
 0xd73   : > { %v2468_v50 = vadd.f32 %v2467_v28, %v4922_v44  ;;  %v4170_v28 = vld [vmem:[#allocation10 + $0x80] ss:$8 sps:$4 sm:$0xff]  }
 0xd74   : > { %v3866_v32 = vpop.f32.mrf.mxu1 }
 0xd75   : > { %v2474_v33 = vsel %vm926_vm2, %v2468_v50, -inf  ;;  %v4174_v32 = vld [vmem:[#allocation13 + $0xb8] sm:$0xff]  }
 0xd76   : > { %2475 = vmax.xlane.f32.xlu0 %v2474_v33  ;;  %v2470_v34 = vpop.f32.mrf.mxu1  ;;  %v4175_v33 = vld [vmem:[#allocation13 + $0xf0] sm:$0xff]  }
 0xd77   : > { %v2471_v35 = vadd.f32 %v2470_v34, %v4922_v44  ;;  %v4141_v44 = vld [vmem:[#allocation8 + $0x2f8] sm:$0xff]  }
 0xd78   : > { %v3867_v36 = vpop.f32.mrf.mxu1  ;;  %3875 = vmatpush3.bf16.msra.mxu0 %v4141_v44  ;;  %v4176_v34 = vld [vmem:[#allocation13 + $0xb0] sm:$0xff]  }
 0xd79   : > { %v2477_v37 = vsel %vm926_vm2, %v2471_v35, -inf  ;;  %3876 = vmatprep.subr.bf16.mxu0 %v4543_v0  ;;  %v4178_v36 = vld [vmem:[#allocation13 + $0xa8] sm:$0xff]  }
 0xd7a   : > { %2478 = vmax.xlane.f32.xlu1 %v2477_v37  ;;  %v4179_v37 = vld [vmem:[#allocation13 + $0xe0] sm:$0xff]  }
 0xd7c   : > { %3877 = vmatpush3.bf16.msra.mxu0 %v4142_v55 }
 0xd7d   : > { %3878 = vmatprep.subr.bf16.mxu0 %v4543_v0 }
 0xd80   : > { %3879 = vmatpush3.bf16.msra.mxu0 %v4143_v56 }
 0xd81   : > { %3880 = vmatprep.subr.bf16.mxu0 %v4543_v0 }
 0xd84   : > { %3881 = vmatpush3.bf16.msra.mxu0 %v4144_v57 }
 0xd85   : > { %3882 = vmatprep.subr.bf16.mxu0 %v4543_v0 }
 0xd88   : > { %3883 = vmatpush3.bf16.msra.mxu0 %v4145_v58 }
 0xd89   : > { %3884 = vmatprep.subr.bf16.mxu0 %v4543_v0 }
 0xd8c   : > { %3885 = vmatpush3.bf16.msra.mxu0 %v4146_v59 }
 0xd8d   : > { %3886 = vmatprep.subr.bf16.mxu0 %v4543_v0 }
 0xd90   : > { %3887 = vmatpush3.bf16.msra.mxu0 %v4147_v3 }
 0xd91   : > { %3888 = vmatprep.subr.bf16.mxu0 %v4543_v0 }
 0xd94   : > { %3889 = vmatpush3.bf16.msra.mxu0 %v4148_v4 }
 0xdff   : > { %v2476_v16 = vpop.xlane.xlu0 %2475 }
 0xe00   : > { %v2480_v39 = vsub.f32 %v2468_v50, %v2476_v16  ;;  %v4173_v50 = vld [vmem:[#allocation13 + $0xf8] sm:$0xff]   ;;  %v4180_v16 = vld [vmem:[#allocation13 + $0xa0] sm:$0xff]  }
 0xe01   : > { %3596 = vmatprep.subr.bf16.mxu0 %v4173_v50 }
 0xe02   : > { %v2482_v43 = vmul.f32 1.442695, %v2480_v39  ;;  %v4181_v39 = vld [vmem:[#allocation13 + $0xd8] sm:$0xff]  }
 0xe03   : > { %v2479_v45 = vpop.xlane.xlu1 %2478 }
 0xe04   : > { %4219 = vpow2.f32 %v2482_v43  ;;  %v2481_v46 = vsub.f32 %v2471_v35, %v2479_v45  ;;  %v4177_v35 = vld [vmem:[#allocation13 + $0xe8] sm:$0xff]   ;;  %v4182_v43 = vld [vmem:[#allocation13 + $0x98] sm:$0xff]  }
 0xe06   : > { %v2484_v47 = vmul.f32 1.442695, %v2481_v46 }
 0xe08   : > { %4221 = vpow2.f32 %v2484_v47 }
 0xe11   : > { %v4220_v48 = vpop.eup %4219 }
 0xe12   : > { %v2486_v49 = vsel %vm926_vm2, %v4220_v48, 0.0 }
 0xe13   : > { %2487 = vadd.xlane.f32.xlu0 %v2486_v49 }
 0xe15   : > { %v4222_v53 = vpop.eup %4221 }
 0xe16   : > { %v2489_v54 = vsel %vm926_vm2, %v4222_v53, 0.0 }
 0xe17   : > { %2490 = vadd.xlane.f32.xlu1 %v2489_v54 }
 0xe9c   : > { %v2488_v60 = vpop.xlane.xlu0 %2487 }
 0xe9d   : > { %4223 = vrcp.f32 %v2488_v60 }
 0xea0   : > { %v2491_v61 = vpop.xlane.xlu1 %2490 }
 0xea1   : > { %4225 = vrcp.f32 %v2491_v61 }
 0xeaa   : > { %v4224_v38 = vpop.eup %4223 }
 0xeab   : > { %v2494_v63 = vmul.f32 %v4224_v38, %v4220_v48 }
 0xeae   : > { %v4226_v62 = vpop.eup %4225 }
 0xeaf   : > { %v2495_v1 = vmul.f32 %v4226_v62, %v4222_v53 }
 0xeb1   : > { %v2496_v2 = vpack.c.bf16 %v2495_v1, %v2494_v63  ;;  %v3400_v63 = vld [vmem:[%s5293_s11 + $0x3] ss:$0 sm:$0xff] }
 0xeb3   : > { %3871 = vmatmul.mubr.msk.bf16.vlgmr.msra.gmra.mxu1 %vm926_vm2, %v2496_v2 }
 0xeb4   : > { %2851 = vmatprep.mubr.bf16.mxu1 %v4546_v51 }
 0xf73   : > { %v2535_v5 = vpop.f32.mrf.mxu1 }
 0xf75   : > { %v3872_v6 = vpop.f32.mrf.mxu1 }
 0xf77   : > { %v2538_v42 = vpop.f32.mrf.mxu1 }
 0xf78   : > { %v2542_v9 = vpack.c.bf16 %v2538_v42, %v2535_v5  ;;  %v3401_v5 = vld [vmem:[%s5294_s27 + $0x3] ss:$0 sm:$0xff] }
 0xf79   : > { %v3873_v11 = vpop.f32.mrf.mxu1 }
 0xf7a   : > { %3891 = vmatmul.mubr.bf16.vlgmr.msra.gmra.mxu0 %v2542_v9 }
 0xf7b   : > { %3597 = vmatpush3.bf16.msra.mxu0 %v4174_v32 }
 0xf7c   : > { %3598 = vmatprep.subr.bf16.mxu0 %v4175_v33 }
 0xf7f   : > { %3599 = vmatpush3.bf16.msra.mxu0 %v4176_v34 }
 0xf80   : > { %3600 = vmatprep.subr.bf16.mxu0 %v4177_v35 }
 0xf83   : > { %3601 = vmatpush3.bf16.msra.mxu0 %v4178_v36 }
 0xf84   : > { %3602 = vmatprep.subr.bf16.mxu0 %v4179_v37 }
 0xf87   : > { %3603 = vmatpush3.bf16.msra.mxu0 %v4180_v16 }
 0xf88   : > { %3604 = vmatprep.subr.bf16.mxu0 %v4181_v39 }
 0xf8b   : > { %3605 = vmatpush3.bf16.msra.mxu0 %v4182_v43 }
0x103a   : > { %v2625_v13 = vpop.f32.mrf.mxu0 }
0x103b   : > { %v5143_v14 = vadd.f32 %v2625_v13, %v5102_v7  ;;  %v4151_v7 = vld [vmem:[#allocation10 + $0xf4] ss:$8 sps:$4 sm:$0xff]  }
0x103c   : > { %v3892_v12 = vpop.f32.mrf.mxu0  ;;  %2819 = vmatprep.subr.bf16.mxu1 %v4151_v7  ;;  %v4183_v13 = vld [vmem:[#allocation13 + $0xd0] sm:$0xff]  }
0x103d   : > { %2636 = vadd.xlane.f32.xlu0 %v5143_v14  ;;  %v2642_v0 = vmul.f32 %v5143_v14, %v5143_v14  ;;  %2820 = vmatpush1.bf16.msra.mxu1 %v4149_v18  ;;  %v4185_v12 = vld [vmem:[#allocation13 + $0xc8] sm:$0xff]  }
0x103e   : > { %v2628_v51 = vpop.f32.mrf.mxu0  ;;  %2821 = vmatprep.subr.bf16.mxu1 %v4154_v19  ;;  %3606 = vmatprep.subr.bf16.mxu0 %v4183_v13 }
0x103f   : > { %v5147_v10 = vadd.f32 %v2628_v51, %v5104_v8  ;;  %v4157_v8 = vld [vmem:[#allocation10 + $0xd4] ss:$8 sps:$4 sm:$0xff]   ;;  %v4186_v51 = vld [vmem:[#allocation13 + $0x88] sm:$0xff]  }
0x1040   : > { %v3893_v15 = vpop.f32.mrf.mxu0 }
0x1041   : > { %2644 = vadd.xlane.f32.xlu0 %v2642_v0  ;;  %2638 = vadd.xlane.f32.xlu1 %v5147_v10  ;;  %v2643_v30 = vmul.f32 %v5147_v10, %v5147_v10  ;;  %v4188_v0 = vld [vmem:[#allocation13 + $0x80] sm:$0xff]   ;;  %v2725_v15 = vld [vmem:[#allocation11 + $0x1] ss:$2 sm:$0x3] }
0x1042   : > { %2822 = vmatpush1.bf16.msra.mxu1 %v4152_v31  ;;  %v2736_v7 = vrot.slane %v2725_v15, %v1186_v52  ;;  %v2732_v18 = vrot.slane %v2725_v15, %v4918_v41 }
0x1043   : > { %2823 = vmatprep.subr.bf16.mxu1 %v4157_v8 }
0x1045   : > { %2646 = vadd.xlane.f32.xlu1 %v2643_v30 }
0x1046   : > { %2824 = vmatpush1.bf16.msra.mxu1 %v4155_v20 }
0x1047   : > { %2825 = vmatprep.subr.bf16.mxu1 %v4160_v22 }
0x104a   : > { %2826 = vmatpush1.bf16.msra.mxu1 %v4158_v21 }
0x104b   : > { %2827 = vmatprep.subr.bf16.mxu1 %v4163_v23 }
0x104e   : > { %2828 = vmatpush1.bf16.msra.mxu1 %v4161_v24 }
0x104f   : > { %2829 = vmatprep.subr.bf16.mxu1 %v4166_v17 }
0x1052   : > { %2830 = vmatpush1.bf16.msra.mxu1 %v4164_v25 }
0x1053   : > { %2831 = vmatprep.subr.bf16.mxu1 %v4169_v26 }
0x1056   : > { %2832 = vmatpush1.bf16.msra.mxu1 %v4167_v27 }
0x1057   : > { %2833 = vmatprep.subr.bf16.mxu1 %v4172_v29 }
0x105a   : > { %2834 = vmatpush1.bf16.msra.mxu1 %v4170_v28 }
0x10c6   : > { %v2637_v45 = vpop.xlane.xlu0 %2636 }
0x10c7   : > { %v2640_v46 = vmul.f32 0.0078125, %v2637_v45 }
0x10c9   : > { %v2650_v49 = vmul.f32 %v2640_v46, %v2640_v46  ;;  %v2654_v61 = vsub.f32 %v5143_v14, %v2640_v46  ;;  %v4184_v14 = vld [vmem:[#allocation13 + $0x90] sm:$0xff]  }
0x10ca   : > { %v2645_v47 = vpop.xlane.xlu0 %2644  ;;  %v2639_v48 = vpop.xlane.xlu1 %2638  ;;  %3607 = vmatpush3.bf16.msra.mxu0 %v4184_v14 }
0x10cb   : > { %v2648_v53 = vmul.f32 0.0078125, %v2645_v47  ;;  %v2641_v54 = vmul.f32 0.0078125, %v2639_v48  ;;  %3608 = vmatprep.subr.bf16.mxu0 %v4185_v12 }
0x10cd   : > { %v2652_v44 = vsub.f32 %v2648_v53, %v2650_v49  ;;  %v2651_v57 = vmul.f32 %v2641_v54, %v2641_v54  ;;  %v2655_v1 = vsub.f32 %v5147_v10, %v2641_v54  ;;  %v4187_v10 = vld [vmem:[#allocation13 + $0xc0] sm:$0xff]  }
0x10ce   : > { %v2647_v55 = vpop.xlane.xlu1 %2646  ;;  %3609 = vmatpush3.bf16.msra.mxu0 %v4186_v51 }
0x10cf   : > { %v2656_v56 = vadd.f32 1e-05, %v2652_v44  ;;  %v2649_v58 = vmul.f32 0.0078125, %v2647_v55  ;;  %3610 = vmatprep.subr.bf16.mxu0 %v4187_v10 }
0x10d1   : > { %4227 = vrsqrt.f32 %v2656_v56  ;;  %v2653_v59 = vsub.f32 %v2649_v58, %v2651_v57 }
0x10d2   : > { %3611 = vmatpush3.bf16.msra.mxu0 %v4188_v0 }
0x10d3   : > { %v2657_v60 = vadd.f32 1e-05, %v2653_v59 }
0x10d5   : > { %4229 = vrsqrt.f32 %v2657_v60 }
0x10de   : > { %v4228_v38 = vpop.eup %4227 }
0x10df   : > { %v2660_v62 = vmul.f32 %v4228_v38, %v2654_v61 }
0x10e1   : > { %v2666_v4 = vmul.f32 %v3400_v63, %v2660_v62  ;;  %v3435_v62 = vld [vmem:[%s5293_s11 + $0x4] ss:$0 sm:$0xff] }
0x10e2   : > { %v4230_v2 = vpop.eup %4229 }
0x10e3   : > { %v2661_v3 = vmul.f32 %v4230_v2, %v2655_v1  ;;  %v2672_v42 = vadd.f32 %v3401_v5, %v2666_v4  ;;  %v3436_v4 = vld [vmem:[%s5294_s27 + $0x4] ss:$0 sm:$0xff] }
0x10e5   : > { %v2667_v6 = vmul.f32 %v3400_v63, %v2661_v3 }
0x10e7   : > { %v2673_v9 = vadd.f32 %v3401_v5, %v2667_v6 }
0x10e9   : > { %v2727_v11 = vpack.c.bf16 %v2673_v9, %v2672_v42 }
0x10eb   : > { %2852 = vmatmul.mubr.bf16.vlgmr.msra.gmra.mxu1 %v2727_v11 }
0x11ab   : > { %v2853_v30 = vpop.f32.mrf.mxu1 }
0x11ac   : > { %v2854_v21 = vadd.f32 %v2853_v30, %v2732_v18 }
0x11ad   : > { %v2855_v19 = vpop.f32.mrf.mxu1 }
0x11ae   : > { %v2856_v8 = vadd.f32 %v2855_v19, %v2736_v7  ;;  %v2862_v26 = vmax.f32 %v2854_v21, 0.0 }
0x11af   : > { %v2857_v31 = vpop.f32.mrf.mxu1 }
0x11b0   : > { %v2858_v20 = vadd.f32 %v2857_v31, %v2732_v18  ;;  %v2863_v17 = vmax.f32 %v2856_v8, 0.0 }
0x11b1   : > { %v2859_v22 = vpop.f32.mrf.mxu1 }
0x11b2   : > { %v2860_v23 = vadd.f32 %v2859_v22, %v2736_v7  ;;  %v2864_v24 = vmax.f32 %v2858_v20, 0.0 }
0x11b4   : > { %v2865_v25 = vmax.f32 %v2860_v23, 0.0  ;;  %v2866_v29 = vpack.c.bf16 %v2864_v24, %v2862_v26 }
0x11b6   : > { %v2867_v27 = vpack.c.bf16 %v2865_v25, %v2863_v17 }
0x11b8   : > { %3000 = vmatprep.mubr.bf16.mxu0 %v2867_v27 }
0x11b9   : > { %3001 = vmatmul.mubr.bf16.vlgmr.msra.gmra.mxu0 %v2866_v29 }
0x1279   : > { %v3612_v28 = vpop.f32.mrf.mxu0 }
0x127b   : > { %v3613_v52 = vpop.f32.mrf.mxu0 }
0x127c   : > { %v3614_v50 = vadd.f32 %v3613_v52, %v3612_v28 }
0x127d   : > { %v3615_v41 = vpop.f32.mrf.mxu0 }
0x127e   : > { %v3003_v32 = vadd.f32 %v3614_v50, %v3418_v40 }
0x127f   : > { %v3616_v33 = vpop.f32.mrf.mxu0 }
0x1280   : > { %v3617_v34 = vadd.f32 %v3616_v33, %v3615_v41  ;;  %v3009_v35 = vadd.f32 %v3003_v32, %v2672_v42 }
0x1282   : > { %v3006_v36 = vadd.f32 %v3617_v34, %v3418_v40  ;;  %3013 = vadd.xlane.f32.xlu0 %v3009_v35  ;;  %v3019_v16 = vmul.f32 %v3009_v35, %v3009_v35 }
0x1284   : > { %v3010_v37 = vadd.f32 %v3006_v36, %v2673_v9 }
0x1286   : > { %3015 = vadd.xlane.f32.xlu1 %v3010_v37  ;;  %3021 = vadd.xlane.f32.xlu0 %v3019_v16  ;;  %v3020_v39 = vmul.f32 %v3010_v37, %v3010_v37 }
0x128a   : > { %3023 = vadd.xlane.f32.xlu1 %v3020_v39 }
0x130b   : > { %v3014_v43 = vpop.xlane.xlu0 %3013 }
0x130c   : > { %v3017_v45 = vmul.f32 0.0078125, %v3014_v43 }
0x130e   : > { %v3027_v48 = vmul.f32 %v3017_v45, %v3017_v45  ;;  %v3031_v60 = vsub.f32 %v3009_v35, %v3017_v45 }
0x130f   : > { %v3016_v46 = vpop.xlane.xlu1 %3015  ;;  %v3022_v47 = vpop.xlane.xlu0 %3021 }
0x1310   : > { %v3018_v49 = vmul.f32 0.0078125, %v3016_v46  ;;  %v3025_v53 = vmul.f32 0.0078125, %v3022_v47 }
0x1312   : > { %v3029_v54 = vsub.f32 %v3025_v53, %v3027_v48  ;;  %v3028_v55 = vmul.f32 %v3018_v49, %v3018_v49  ;;  %v3032_v63 = vsub.f32 %v3010_v37, %v3018_v49 }
0x1313   : > { %v3024_v44 = vpop.xlane.xlu1 %3023 }
0x1314   : > { %v3033_v56 = vadd.f32 1e-05, %v3029_v54  ;;  %v3026_v57 = vmul.f32 0.0078125, %v3024_v44 }
0x1316   : > { %4231 = vrsqrt.f32 %v3033_v56  ;;  %v3030_v58 = vsub.f32 %v3026_v57, %v3028_v55 }
0x1318   : > { %v3034_v59 = vadd.f32 1e-05, %v3030_v58 }
0x131a   : > { %4233 = vrsqrt.f32 %v3034_v59 }
0x1323   : > { %v4232_v61 = vpop.eup %4231 }
0x1324   : > { %v3037_v38 = vmul.f32 %v4232_v61, %v3031_v60 }
0x1326   : > { %v3043_v2 = vmul.f32 %v3435_v62, %v3037_v38 }
0x1327   : > { %v4234_v1 = vpop.eup %4233 }
0x1328   : > { %v3038_v3 = vmul.f32 %v4234_v1, %v3032_v63  ;;  %v3049_v6 = vadd.f32 %v3436_v4, %v3043_v2 }
0x132a   : > { %v3044_v5 = vmul.f32 %v3435_v62, %v3038_v3 }
0x132c   : > { %v3050_v42 = vadd.f32 %v3436_v4, %v3044_v5 }
0x132e   : > { %v3452_v9 = vpack.c.bf16 %v3050_v42, %v3049_v6 }
0x1330   : > { %3453 = vst [vmem:[%s517_s24] sm:$0xff] %v3452_v9  }
0x1331   : > { %4462 = shalt.err (!%p4459_p12)
}
0x1332   : > { %s4463_s17 = scalar_lea.hbm %s5176_s8, 128  ;;  %s4467_s1 = scalar_lea.hbm %s5296_s29, 256 }
0x1333   : > { %p4464_p2 = scmp.ne.s32.totalorder %s5176_s8, %s4463_s17  ;;  %p4468_p10 = scmp.lt.s32.totalorder %s5176_s8, %s5296_s29 }
0x1334   : > { %p4469_p0 = scmp.lt.s32.totalorder %s4467_s1, %s4463_s17 }
0x1335   : > { %p4465_p13 = pnand %p4464_p2, %p5297_p1 }
0x1336   : > { %p4470_p5 = por %p4469_p0, %p4468_p10 }
0x1337   : > { %p4466_p9 = pneg %p4465_p13 }
0x1339   : > { %p4471_p6 = pnand %p4470_p5, %p4466_p9 }
0x133b   : > { %4474 = shalt.err (!%p4471_p6)
}
0x133c   : > { %s4548_s22 = smov 64   ;;  %s4549_s18 = smov 4  }
0x133d   : > { %3920 = dma.vmem_to_hbm [thread:$0]  (%p5297_p1), %s5178_s9, 128, %s5176_s8, %s3062_s10, %s4548_s22, %s4548_s22, %s4549_s18  }
0x133e PF: > { %s5298_s25 = sld [smem:[#allocation23_spill]]  ;;  %p5301_p7 = scmp.ge.s32.totalorder %s4529_s16, 2 }
0x133f   : > { %s5299_s24 = sld [smem:[#allocation28_spill]] }
0x1344   : > { %s3090_s28 = sand.u32 1, %s5298_s25  }
0x1345   : > { %p5300_p4 = scmp.ne.s32.totalorder %s5299_s24, 0  ;;  %s3091_s5 = scalar_lea.sflag [#allocation4], %s3090_s28 }
0x1347   : > { %p3949_p8 = pnand %p5301_p7, %p5300_p4 }
0x1349   : > { %p3950_p11 = pneg %p3949_p8 }
0x134b   : > { %4512 = dma.done.wait (%p3950_p11), %s3091_s5, 128  }
0x134c   : > { %4514 = vsyncadd (%p3950_p11), %s3091_s5, 4294967168  ;;  %s5302_s16 = sld [smem:[#allocation25_spill]]  ;;  %s5305_s13 = smov %s4521_s14 }
0x134d   : > { %s5303_s3 = sld [smem:[#allocation24_spill]] }
0x134e   : > { %s5304_s15 = sld [smem:[#allocation27_spill]] }
0x1352   : > { %p29_p3 = scmp.ge.s32.totalorder %s5302_s16, 4  }
0x1353   : > { %s5306_s14 = smov %s5303_s3 }
0x1354   :  { %31 = sbr.rel (!%p29_p3) target bundleno = 17 (0x11), region = 163 }
0x1359   :  { %3096 = vsyncpa [#allocation3], 1 }
0x135a   :  { %3098 = vsyncpa [#allocation3 + $0x1], 1 }
0x135b   :  { %3099 = vsyncpa [#allocation6], 1 }
0x135c   :  { %3101 = vsyncpa [#allocation6 + $0x1], 1 }
0x135d   :  { %3102 = vsyncpa [#allocation9], 1 }
0x135e   :  { %3103 = vsyncpa [#allocation12], 1 }
0x135f   :  { %3104 = vsyncpa [#allocation15], 1 }
0x1360   :  { %3105 = vsyncpa [#allocation4], 1 }
0x1361   :  { %3107 = vsyncpa [#allocation4 + $0x1], 1 }

</bundles_post_ra>
